<compile_context>
chip_gen: v6e
topology: v6e:2x2x1
jax: 0.10.0
libtpu: 0.0.40
codegen_flags: <defaults>
</compile_context>

<pallas_src>
import numpy as np
import jax
import jax.numpy as jnp
from jax.experimental import pallas as pl
from jax.experimental.pallas import tpu as pltpu

EPS = float(np.finfo(np.float32).eps)
HIDDEN = 16
NUM_PROP = 5


def node_gnn_kernel(s_blk_ref, s_scat_ref, ff_pre_ref, inv_deg_ref, agg_bias_ref,
                    b_t_ref, target_t_ref,
                    w1_in_ref, w1_out_ref, w2_ref,
                    wgru_x_ref, wgru_h_ref, b_gru_ref,
                    wo1a_t_ref, wo1b_t_ref, bo1_t_ref, wo2_ref, bo2_t_ref,
                    y_ref, loss_ref):
    f32 = jnp.float32
    H = HIDDEN

    # bf16 0/1 indicator matrices: DMA'd half-width, widened once to f32 here.
    s_blk = s_blk_ref[...].astype(f32)        # [E, 2N]  cols: gather(edge_in) | gather(edge_out)
    s_scat = s_scat_ref[...].astype(f32)      # [N, E]   unscaled scatter-add matrix (S_out^T)
    ff_pre = ff_pre_ref[...]                  # [E, 64]  loop-invariant ff contribution (incl. b1)
    inv_deg = inv_deg_ref[...]                # [N, 1]   f32 1/(deg+eps)
    agg_bias = agg_bias_ref[...]              # [N, H]   deg/(deg+eps) * b2 (exact bias correction)

    n_node = s_scat.shape[0]

    # Loop-invariant weights read once.
    w1_in = w1_in_ref[...]                    # [H, 64]
    w1_out = w1_out_ref[...]                  # [H, 64]
    w2 = w2_ref[...]                          # [64, H]
    wgru_x = wgru_x_ref[...]                  # [H, 4H]  cols: r | z | n_x | 0
    wgru_h = wgru_h_ref[...]                  # [H, 4H]  cols: r | z | 0 | n_h
    b_gru = b_gru_ref[...]                    # [1, 4H]  sublane-broadcast bias

    def prop(_, state):
        # project-then-gather: 64-lane outputs, E row pushes through the MXU.
        p_in = jnp.dot(state, w1_in, preferred_element_type=f32)     # [N, 64]
        p_out = jnp.dot(state, w1_out, preferred_element_type=f32)   # [N, 64]
        p_stack = jnp.concatenate([p_in, p_out], axis=0)             # [2N, 64] sublane stack
        h1 = jnp.maximum(
            jnp.dot(s_blk, p_stack, preferred_element_type=f32) + ff_pre, 0.0)  # [E, 64]

        # scatter-add first (64-lane dot), then project with w2 over N rows;
        # mean normalization applied as an f32 [N,1] VPU multiply.
        acc = jnp.dot(s_scat, h1, preferred_element_type=f32)        # [N, 64]
        msg_agg = (jnp.dot(acc, w2, preferred_element_type=f32) * inv_deg
                   + agg_bias)                                       # [N, H]

        # GRUCell(msg_agg, state): two dots, no lane-axis concat.
        g = (jnp.dot(msg_agg, wgru_x, preferred_element_type=f32)
             + jnp.dot(state, wgru_h, preferred_element_type=f32)
             + b_gru)                                                # [N, 4H]
        r = jax.nn.sigmoid(g[:, 0:H])
        z = jax.nn.sigmoid(g[:, H:2 * H])
        n_gate = jnp.tanh(g[:, 2 * H:3 * H] + r * g[:, 3 * H:4 * H])
        return (1.0 - z) * n_gate + z * state

    state = jax.lax.fori_loop(0, NUM_PROP, prop,
                              jnp.zeros((n_node, H), f32), unroll=True)

    # output_func on cat([state, b, -b]) computed transposed (nodes on lanes):
    # h_t = relu(Wo1_state @ state^T + (Wo1_b - Wo1_-b) b^T + bo1)
    h_t = jnp.maximum(
        jnp.dot(wo1a_t_ref[...], state.T, preferred_element_type=f32)
        + wo1b_t_ref[...] * b_t_ref[...]
        + bo1_t_ref[...], 0.0)                                       # [64, N]
    logits_t = (jnp.dot(wo2_ref[...], h_t, preferred_element_type=f32)
                + bo2_t_ref[...])                                    # [2, N]

    # log_softmax over the 2 classes (sublane rows) -> lane-dense y output.
    l0 = logits_t[0:1, :]
    l1 = logits_t[1:2, :]
    m = jnp.maximum(l0, l1)
    lse = m + jnp.log(jnp.exp(l0 - m) + jnp.exp(l1 - m))              # [1, N]
    y_t = logits_t - lse                                              # [2, N]
    y_ref[...] = y_t

    # KLDivLoss(reduction='batchmean'): sum(t * (log t - y)) / N, 0 where t == 0
    t = target_t_ref[...]
    safe_t = jnp.where(t > 0.0, t, 1.0)
    kl = jnp.where(t > 0.0, t * (jnp.log(safe_t) - y_t), 0.0)         # [2, N]
    total = jnp.sum(kl[0:1, :] + kl[1:2, :], axis=1, keepdims=True)   # [1, 1]
    loss_ref[...] = total / jnp.float32(n_node)


def make_params(key):
    def lin(k, out_dim, in_dim):
        kw, kb = jax.random.split(k)
        bound = 1.0 / np.sqrt(in_dim)
        w = jax.random.uniform(kw, (out_dim, in_dim), jnp.float32, -bound, bound)
        b = jax.random.uniform(kb, (out_dim,), jnp.float32, -bound, bound)
        return w, b

    ks = jax.random.split(key, 6)
    p = {}
    p['W1'], p['b1'] = lin(ks[0], 64, 2 * HIDDEN + 8)      # msg_func layer 0
    p['W2'], p['b2'] = lin(ks[1], HIDDEN, 64)               # msg_func layer 2
    p['W_ih'], p['b_ih'] = lin(ks[2], 3 * HIDDEN, HIDDEN)   # GRUCell input weights
    p['W_hh'], p['b_hh'] = lin(ks[3], 3 * HIDDEN, HIDDEN)   # GRUCell hidden weights
    p['Wo1'], p['bo1'] = lin(ks[4], 64, HIDDEN + 2)         # output_func layer 0
    p['Wo2'], p['bo2'] = lin(ks[5], 2, 64)                  # output_func layer 2
    return p


def node_gnn_forward(J_msg, b, msg_node, target, params):
    N = b.shape[0]
    E = msg_node.shape[0]
    H = HIDDEN
    f32 = jnp.float32

    edge_in = msg_node[:, 0]
    edge_out = msg_node[:, 1]

    # --- glue: bf16 0/1 gather/scatter matrices (exact) ------------------------
    s_in = jax.nn.one_hot(edge_in, N, dtype=jnp.bfloat16)     # [E, N]
    s_out = jax.nn.one_hot(edge_out, N, dtype=jnp.bfloat16)   # [E, N]
    s_blk = jnp.concatenate([s_in, s_out], axis=1)            # [E, 2N] fused gather
    s_scat = s_out.T                                          # [N, E]  unscaled scatter-add

    # degree via segment-sum (no O(E*N) reduce), mean scale kept in f32
    deg = jnp.zeros((N,), f32).at[edge_out].add(1.0)
    inv_deg = 1.0 / (deg + EPS)                               # [N]
    inv_deg_col = inv_deg[:, None]                            # [N, 1] f32
    agg_bias = (deg * inv_deg)[:, None] * params['b2'][None, :]   # [N, H] = deg/(deg+eps)*b2

    # --- glue: loop-invariant edge features -----------------------------------
    ff_in = jnp.concatenate([b[edge_in], -b[edge_in], J_msg, -J_msg], axis=1)     # [E,4]
    ff_out = jnp.concatenate([-b[edge_out], b[edge_out], -J_msg, J_msg], axis=1)  # [E,4]

    W1 = params['W1']                        # [64, 40] cols: state_in|ff_in|state_out|ff_out
    b1 = params['b1']
    ff_pre = (ff_in @ W1[:, H:H + 4].T
              + ff_out @ W1[:, 2 * H + 4:].T
              + b1[None, :])                                  # [E, 64]
    w1_in = W1[:, 0:H].T                     # [H, 64] weights acting on state[edge_in]
    w1_out = W1[:, H + 4:2 * H + 4].T        # [H, 64] weights acting on state[edge_out]
    w2 = params['W2'].T                      # [64, H]

    # --- glue: GRU weights split into x / h halves [H, 4H], cols r|z|n_x|n_h ---
    Wi = params['W_ih'].T                    # [H, 3H] cols r|z|n
    Wh = params['W_hh'].T                    # [H, 3H]
    zH = jnp.zeros((H, H), f32)
    wgru_x = jnp.concatenate([Wi, zH], axis=1)                         # [H, 4H]
    wgru_h = jnp.concatenate([Wh[:, 0:2 * H], zH, Wh[:, 2 * H:]], axis=1)  # [H, 4H]
    b_ih, b_hh = params['b_ih'], params['b_hh']
    b_gru = jnp.concatenate([b_ih[0:2 * H] + b_hh[0:2 * H],
                             b_ih[2 * H:],
                             b_hh[2 * H:]])[None, :]          # [1, 4H]

    # --- glue: output layer (transposed / lane-dense form) ---------------------
    Wo1 = params['Wo1']                      # [64, 18] cols: state|b|-b
    wo1a_t = Wo1[:, 0:H]                     # [64, H]
    wo1b_t = (Wo1[:, H] - Wo1[:, H + 1])[:, None]             # [64, 1]
    bo1_t = params['bo1'][:, None]           # [64, 1]
    wo2 = params['Wo2']                      # [2, 64]
    bo2_t = params['bo2'][:, None]           # [2, 1]

    b_t = b.T                                # [1, N]
    target_t = target.T                      # [2, N]

    inputs = (s_blk, s_scat, ff_pre, inv_deg_col, agg_bias, b_t, target_t,
              w1_in, w1_out, w2, wgru_x, wgru_h, b_gru,
              wo1a_t, wo1b_t, bo1_t, wo2, bo2_t)

    # VMEM budget per generation: query capacity, size to footprint + headroom.
    try:
        vmem_cap = int(pltpu.get_tpu_info().vmem_capacity_bytes)
    except Exception:
        vmem_cap = 64 * 1024 * 1024
    in_bytes = sum(int(np.prod(a.shape)) * int(np.dtype(a.dtype).itemsize) for a in inputs)
    vmem_limit = int(min(vmem_cap * 7 // 8, max(16 * 1024 * 1024, 6 * in_bytes)))

    vmem_spec = pl.BlockSpec(memory_space=pltpu.MemorySpace.VMEM)
    y_t, loss = pl.pallas_call(
        node_gnn_kernel,
        out_shape=(jax.ShapeDtypeStruct((2, N), jnp.float32),
                   jax.ShapeDtypeStruct((1, 1), jnp.float32)),
        in_specs=[vmem_spec] * len(inputs),
        out_specs=(vmem_spec, vmem_spec),
        compiler_params=pltpu.CompilerParams(vmem_limit_bytes=vmem_limit),
    )(*inputs)
    return y_t.T, loss[0, 0]


def node_gnn_reference(J_msg, b, msg_node, target, params):
    """Pure-JAX reference matching the PyTorch forward."""
    N = b.shape[0]
    E = msg_node.shape[0]
    H = HIDDEN
    edge_in = msg_node[:, 0]
    edge_out = msg_node[:, 1]
    ff_in = jnp.concatenate([b[edge_in], -b[edge_in], J_msg, -J_msg], axis=1)
    ff_out = jnp.concatenate([-b[edge_out], b[edge_out], -J_msg, J_msg], axis=1)
    state = jnp.zeros((N, H), jnp.float32)
    for _ in range(NUM_PROP):
        x = jnp.concatenate([state[edge_in], ff_in, state[edge_out], ff_out], axis=1)
        h1 = jax.nn.relu(x @ params['W1'].T + params['b1'])
        msg = h1 @ params['W2'].T + params['b2']
        msg_agg = jnp.zeros((N, H), jnp.float32).at[edge_out].add(msg)
        deg = jnp.zeros((N,), jnp.float32).at[edge_out].add(jnp.ones((E,), jnp.float32))
        msg_agg = msg_agg / (deg[:, None] + EPS)
        gx = msg_agg @ params['W_ih'].T + params['b_ih']
        gh = state @ params['W_hh'].T + params['b_hh']
        r = jax.nn.sigmoid(gx[:, :H] + gh[:, :H])
        z = jax.nn.sigmoid(gx[:, H:2 * H] + gh[:, H:2 * H])
        n = jnp.tanh(gx[:, 2 * H:] + r * gh[:, 2 * H:])
        state = (1.0 - z) * n + z * state
    xo = jnp.concatenate([state, b, -b], axis=1)
    h = jax.nn.relu(xo @ params['Wo1'].T + params['bo1'])
    logits = h @ params['Wo2'].T + params['bo2']
    y = jax.nn.log_softmax(logits, axis=1)
    kl = jnp.where(target > 0, target * (jnp.log(jnp.where(target > 0, target, 1.0)) - y), 0.0)
    loss = jnp.sum(kl) / N
    return y, loss


if __name__ == "__main__":
    key = jax.random.PRNGKey(0)
    k_param, k_b, k_j, k_e, k_t = jax.random.split(key, 5)

    N = 8    # num_node
    E = 16   # num_edge

    params = make_params(k_param)
    b = jax.random.normal(k_b, (N, 1), jnp.float32)
    J_msg = jax.random.normal(k_j, (E, 1), jnp.float32)
    msg_node = jax.random.randint(k_e, (E, 2), 0, N, dtype=jnp.int32)
    target = jax.nn.softmax(jax.random.normal(k_t, (N, 2), jnp.float32), axis=1)

    y, loss = node_gnn_forward(J_msg, b, msg_node, target, params)
    jax.block_until_ready((y, loss))

    y_ref, loss_ref = node_gnn_reference(J_msg, b, msg_node, target, params)
    np.testing.assert_allclose(np.asarray(y), np.asarray(y_ref), rtol=1e-4, atol=1e-4)
    np.testing.assert_allclose(np.asarray(loss), np.asarray(loss_ref), rtol=1e-4, atol=1e-4)

    print("KERNEL_OK")
</pallas_src>

<mosaic_0001>
module attributes {stable_mosaic.version = 11 : i64} {
  func.func @node_gnn_kernel(%arg0: memref<16x16xbf16, #tpu.memory_space<vmem>>, %arg1: memref<8x16xbf16, #tpu.memory_space<vmem>>, %arg2: memref<16x64xf32, #tpu.memory_space<vmem>>, %arg3: memref<8x1xf32, #tpu.memory_space<vmem>>, %arg4: memref<8x16xf32, #tpu.memory_space<vmem>>, %arg5: memref<1x8xf32, #tpu.memory_space<vmem>>, %arg6: memref<2x8xf32, #tpu.memory_space<vmem>>, %arg7: memref<16x64xf32, #tpu.memory_space<vmem>>, %arg8: memref<16x64xf32, #tpu.memory_space<vmem>>, %arg9: memref<64x16xf32, #tpu.memory_space<vmem>>, %arg10: memref<16x64xf32, #tpu.memory_space<vmem>>, %arg11: memref<16x64xf32, #tpu.memory_space<vmem>>, %arg12: memref<1x64xf32, #tpu.memory_space<vmem>>, %arg13: memref<64x16xf32, #tpu.memory_space<vmem>>, %arg14: memref<64x1xf32, #tpu.memory_space<vmem>>, %arg15: memref<64x1xf32, #tpu.memory_space<vmem>>, %arg16: memref<2x64xf32, #tpu.memory_space<vmem>>, %arg17: memref<2x1xf32, #tpu.memory_space<vmem>>, %arg18: memref<2x8xf32, #tpu.memory_space<vmem>>, %arg19: memref<1x1xf32, #tpu.memory_space<vmem>>) attributes {dimension_semantics = [], scalar_prefetch = 0 : i64, scratch_operands = 0 : i64, tpu.core_type = #tpu.core_type<tc>} {
    %c0 = arith.constant 0 : index
    %c0_0 = arith.constant 0 : index
    %0 = vector.load %arg0[%c0, %c0_0] : memref<16x16xbf16, #tpu.memory_space<vmem>>, vector<16x16xbf16>
    %1 = arith.extf %0 : vector<16x16xbf16> to vector<16x16xf32>
    %c0_1 = arith.constant 0 : index
    %c0_2 = arith.constant 0 : index
    %2 = vector.load %arg1[%c0_1, %c0_2] : memref<8x16xbf16, #tpu.memory_space<vmem>>, vector<8x16xbf16>
    %3 = arith.extf %2 : vector<8x16xbf16> to vector<8x16xf32>
    %c0_3 = arith.constant 0 : index
    %c0_4 = arith.constant 0 : index
    %4 = vector.load %arg2[%c0_3, %c0_4] : memref<16x64xf32, #tpu.memory_space<vmem>>, vector<16x64xf32>
    %c0_5 = arith.constant 0 : index
    %c0_6 = arith.constant 0 : index
    %5 = vector.load %arg3[%c0_5, %c0_6] : memref<8x1xf32, #tpu.memory_space<vmem>>, vector<8x1xf32>
    %c0_7 = arith.constant 0 : index
    %c0_8 = arith.constant 0 : index
    %6 = vector.load %arg4[%c0_7, %c0_8] : memref<8x16xf32, #tpu.memory_space<vmem>>, vector<8x16xf32>
    %c0_9 = arith.constant 0 : index
    %c0_10 = arith.constant 0 : index
    %7 = vector.load %arg7[%c0_9, %c0_10] : memref<16x64xf32, #tpu.memory_space<vmem>>, vector<16x64xf32>
    %c0_11 = arith.constant 0 : index
    %c0_12 = arith.constant 0 : index
    %8 = vector.load %arg8[%c0_11, %c0_12] : memref<16x64xf32, #tpu.memory_space<vmem>>, vector<16x64xf32>
    %c0_13 = arith.constant 0 : index
    %c0_14 = arith.constant 0 : index
    %9 = vector.load %arg9[%c0_13, %c0_14] : memref<64x16xf32, #tpu.memory_space<vmem>>, vector<64x16xf32>
    %c0_15 = arith.constant 0 : index
    %c0_16 = arith.constant 0 : index
    %10 = vector.load %arg10[%c0_15, %c0_16] : memref<16x64xf32, #tpu.memory_space<vmem>>, vector<16x64xf32>
    %c0_17 = arith.constant 0 : index
    %c0_18 = arith.constant 0 : index
    %11 = vector.load %arg11[%c0_17, %c0_18] : memref<16x64xf32, #tpu.memory_space<vmem>>, vector<16x64xf32>
    %c0_19 = arith.constant 0 : index
    %c0_20 = arith.constant 0 : index
    %12 = vector.load %arg12[%c0_19, %c0_20] : memref<1x64xf32, #tpu.memory_space<vmem>>, vector<1x64xf32>
    %cst = arith.constant 0.000000e+00 : f32
    %13 = vector.broadcast %cst : f32 to vector<8x16xf32>
    %c0_i32 = arith.constant 0 : i32
    %cst_21 = arith.constant dense<0.000000e+00> : vector<8x64xf32>
    %14 = tpu.matmul %13, %7, %cst_21 {dimension_numbers = #tpu.dot_dimension_numbers<[1], [0], [0], [1], [0, 0, 1, 1], [], []>} : vector<8x16xf32>, vector<16x64xf32>, vector<8x64xf32> -> vector<8x64xf32>
    %cst_22 = arith.constant dense<0.000000e+00> : vector<8x64xf32>
    %15 = tpu.matmul %13, %8, %cst_22 {dimension_numbers = #tpu.dot_dimension_numbers<[1], [0], [0], [1], [0, 0, 1, 1], [], []>} : vector<8x16xf32>, vector<16x64xf32>, vector<8x64xf32> -> vector<8x64xf32>
    %16 = tpu.concatenate %14, %15 in 0 : vector<8x64xf32>, vector<8x64xf32> -> vector<16x64xf32>
    %cst_23 = arith.constant dense<0.000000e+00> : vector<16x64xf32>
    %17 = tpu.matmul %1, %16, %cst_23 {dimension_numbers = #tpu.dot_dimension_numbers<[1], [0], [0], [1], [0, 0, 1, 1], [], []>} : vector<16x16xf32>, vector<16x64xf32>, vector<16x64xf32> -> vector<16x64xf32>
    %18 = arith.addf %17, %4 : vector<16x64xf32>
    %cst_24 = arith.constant 0.000000e+00 : f32
    %19 = vector.broadcast %cst_24 : f32 to vector<16x64xf32>
    %20 = arith.maximumf %18, %19 : vector<16x64xf32>
    %cst_25 = arith.constant dense<0.000000e+00> : vector<8x64xf32>
    %21 = tpu.matmul %3, %20, %cst_25 {dimension_numbers = #tpu.dot_dimension_numbers<[1], [0], [0], [1], [0, 0, 1, 1], [], []>} : vector<8x16xf32>, vector<16x64xf32>, vector<8x64xf32> -> vector<8x64xf32>
    %cst_26 = arith.constant dense<0.000000e+00> : vector<8x16xf32>
    %22 = tpu.matmul %21, %9, %cst_26 {dimension_numbers = #tpu.dot_dimension_numbers<[1], [0], [0], [1], [0, 0, 1, 1], [], []>} : vector<8x64xf32>, vector<64x16xf32>, vector<8x16xf32> -> vector<8x16xf32>
    %23 = vector.broadcast %5 : vector<8x1xf32> to vector<8x16xf32>
    %24 = arith.mulf %22, %23 : vector<8x16xf32>
    %25 = arith.addf %24, %6 : vector<8x16xf32>
    %cst_27 = arith.constant dense<0.000000e+00> : vector<8x64xf32>
    %26 = tpu.matmul %25, %10, %cst_27 {dimension_numbers = #tpu.dot_dimension_numbers<[1], [0], [0], [1], [0, 0, 1, 1], [], []>} : vector<8x16xf32>, vector<16x64xf32>, vector<8x64xf32> -> vector<8x64xf32>
    %cst_28 = arith.constant dense<0.000000e+00> : vector<8x64xf32>
    %27 = tpu.matmul %13, %11, %cst_28 {dimension_numbers = #tpu.dot_dimension_numbers<[1], [0], [0], [1], [0, 0, 1, 1], [], []>} : vector<8x16xf32>, vector<16x64xf32>, vector<8x64xf32> -> vector<8x64xf32>
    %28 = arith.addf %26, %27 : vector<8x64xf32>
    %29 = vector.broadcast %12 : vector<1x64xf32> to vector<8x64xf32>
    %30 = arith.addf %28, %29 : vector<8x64xf32>
    %31 = vector.extract_strided_slice %30 {offsets = [0, 0], sizes = [8, 16], strides = [1, 1]} : vector<8x64xf32> to vector<8x16xf32>
    %32 = arith.negf %31 : vector<8x16xf32>
    %33 = math.exp %32 : vector<8x16xf32>
    %cst_29 = arith.constant 1.000000e+00 : f32
    %34 = vector.broadcast %cst_29 : f32 to vector<8x16xf32>
    %35 = arith.addf %34, %33 : vector<8x16xf32>
    %36 = arith.divf %34, %35 : vector<8x16xf32>
    %37 = vector.extract_strided_slice %30 {offsets = [0, 16], sizes = [8, 16], strides = [1, 1]} : vector<8x64xf32> to vector<8x16xf32>
    %38 = arith.negf %37 : vector<8x16xf32>
    %39 = math.exp %38 : vector<8x16xf32>
    %cst_30 = arith.constant 1.000000e+00 : f32
    %40 = vector.broadcast %cst_30 : f32 to vector<8x16xf32>
    %41 = arith.addf %40, %39 : vector<8x16xf32>
    %42 = arith.divf %40, %41 : vector<8x16xf32>
    %43 = vector.extract_strided_slice %30 {offsets = [0, 32], sizes = [8, 16], strides = [1, 1]} : vector<8x64xf32> to vector<8x16xf32>
    %44 = vector.extract_strided_slice %30 {offsets = [0, 48], sizes = [8, 16], strides = [1, 1]} : vector<8x64xf32> to vector<8x16xf32>
    %45 = arith.mulf %36, %44 : vector<8x16xf32>
    %46 = arith.addf %43, %45 : vector<8x16xf32>
    %47 = math.tanh %46 : vector<8x16xf32>
    %cst_31 = arith.constant 1.000000e+00 : f32
    %48 = vector.broadcast %cst_31 : f32 to vector<8x16xf32>
    %49 = arith.subf %48, %42 : vector<8x16xf32>
    %50 = arith.mulf %49, %47 : vector<8x16xf32>
    %51 = arith.mulf %42, %13 : vector<8x16xf32>
    %52 = arith.addf %50, %51 : vector<8x16xf32>
    %c1_i32 = arith.constant 1 : i32
    %cst_32 = arith.constant dense<0.000000e+00> : vector<8x64xf32>
    %53 = tpu.matmul %52, %7, %cst_32 {dimension_numbers = #tpu.dot_dimension_numbers<[1], [0], [0], [1], [0, 0, 1, 1], [], []>} : vector<8x16xf32>, vector<16x64xf32>, vector<8x64xf32> -> vector<8x64xf32>
    %cst_33 = arith.constant dense<0.000000e+00> : vector<8x64xf32>
    %54 = tpu.matmul %52, %8, %cst_33 {dimension_numbers = #tpu.dot_dimension_numbers<[1], [0], [0], [1], [0, 0, 1, 1], [], []>} : vector<8x16xf32>, vector<16x64xf32>, vector<8x64xf32> -> vector<8x64xf32>
    %55 = tpu.concatenate %53, %54 in 0 : vector<8x64xf32>, vector<8x64xf32> -> vector<16x64xf32>
    %cst_34 = arith.constant dense<0.000000e+00> : vector<16x64xf32>
    %56 = tpu.matmul %1, %55, %cst_34 {dimension_numbers = #tpu.dot_dimension_numbers<[1], [0], [0], [1], [0, 0, 1, 1], [], []>} : vector<16x16xf32>, vector<16x64xf32>, vector<16x64xf32> -> vector<16x64xf32>
    %57 = arith.addf %56, %4 : vector<16x64xf32>
    %cst_35 = arith.constant 0.000000e+00 : f32
    %58 = vector.broadcast %cst_35 : f32 to vector<16x64xf32>
    %59 = arith.maximumf %57, %58 : vector<16x64xf32>
    %cst_36 = arith.constant dense<0.000000e+00> : vector<8x64xf32>
    %60 = tpu.matmul %3, %59, %cst_36 {dimension_numbers = #tpu.dot_dimension_numbers<[1], [0], [0], [1], [0, 0, 1, 1], [], []>} : vector<8x16xf32>, vector<16x64xf32>, vector<8x64xf32> -> vector<8x64xf32>
    %cst_37 = arith.constant dense<0.000000e+00> : vector<8x16xf32>
    %61 = tpu.matmul %60, %9, %cst_37 {dimension_numbers = #tpu.dot_dimension_numbers<[1], [0], [0], [1], [0, 0, 1, 1], [], []>} : vector<8x64xf32>, vector<64x16xf32>, vector<8x16xf32> -> vector<8x16xf32>
    %62 = vector.broadcast %5 : vector<8x1xf32> to vector<8x16xf32>
    %63 = arith.mulf %61, %62 : vector<8x16xf32>
    %64 = arith.addf %63, %6 : vector<8x16xf32>
    %cst_38 = arith.constant dense<0.000000e+00> : vector<8x64xf32>
    %65 = tpu.matmul %64, %10, %cst_38 {dimension_numbers = #tpu.dot_dimension_numbers<[1], [0], [0], [1], [0, 0, 1, 1], [], []>} : vector<8x16xf32>, vector<16x64xf32>, vector<8x64xf32> -> vector<8x64xf32>
    %cst_39 = arith.constant dense<0.000000e+00> : vector<8x64xf32>
    %66 = tpu.matmul %52, %11, %cst_39 {dimension_numbers = #tpu.dot_dimension_numbers<[1], [0], [0], [1], [0, 0, 1, 1], [], []>} : vector<8x16xf32>, vector<16x64xf32>, vector<8x64xf32> -> vector<8x64xf32>
    %67 = arith.addf %65, %66 : vector<8x64xf32>
    %68 = vector.broadcast %12 : vector<1x64xf32> to vector<8x64xf32>
    %69 = arith.addf %67, %68 : vector<8x64xf32>
    %70 = vector.extract_strided_slice %69 {offsets = [0, 0], sizes = [8, 16], strides = [1, 1]} : vector<8x64xf32> to vector<8x16xf32>
    %71 = arith.negf %70 : vector<8x16xf32>
    %72 = math.exp %71 : vector<8x16xf32>
    %cst_40 = arith.constant 1.000000e+00 : f32
    %73 = vector.broadcast %cst_40 : f32 to vector<8x16xf32>
    %74 = arith.addf %73, %72 : vector<8x16xf32>
    %75 = arith.divf %73, %74 : vector<8x16xf32>
    %76 = vector.extract_strided_slice %69 {offsets = [0, 16], sizes = [8, 16], strides = [1, 1]} : vector<8x64xf32> to vector<8x16xf32>
    %77 = arith.negf %76 : vector<8x16xf32>
    %78 = math.exp %77 : vector<8x16xf32>
    %cst_41 = arith.constant 1.000000e+00 : f32
    %79 = vector.broadcast %cst_41 : f32 to vector<8x16xf32>
    %80 = arith.addf %79, %78 : vector<8x16xf32>
    %81 = arith.divf %79, %80 : vector<8x16xf32>
    %82 = vector.extract_strided_slice %69 {offsets = [0, 32], sizes = [8, 16], strides = [1, 1]} : vector<8x64xf32> to vector<8x16xf32>
    %83 = vector.extract_strided_slice %69 {offsets = [0, 48], sizes = [8, 16], strides = [1, 1]} : vector<8x64xf32> to vector<8x16xf32>
    %84 = arith.mulf %75, %83 : vector<8x16xf32>
    %85 = arith.addf %82, %84 : vector<8x16xf32>
    %86 = math.tanh %85 : vector<8x16xf32>
    %cst_42 = arith.constant 1.000000e+00 : f32
    %87 = vector.broadcast %cst_42 : f32 to vector<8x16xf32>
    %88 = arith.subf %87, %81 : vector<8x16xf32>
    %89 = arith.mulf %88, %86 : vector<8x16xf32>
    %90 = arith.mulf %81, %52 : vector<8x16xf32>
    %91 = arith.addf %89, %90 : vector<8x16xf32>
    %c2_i32 = arith.constant 2 : i32
    %cst_43 = arith.constant dense<0.000000e+00> : vector<8x64xf32>
    %92 = tpu.matmul %91, %7, %cst_43 {dimension_numbers = #tpu.dot_dimension_numbers<[1], [0], [0], [1], [0, 0, 1, 1], [], []>} : vector<8x16xf32>, vector<16x64xf32>, vector<8x64xf32> -> vector<8x64xf32>
    %cst_44 = arith.constant dense<0.000000e+00> : vector<8x64xf32>
    %93 = tpu.matmul %91, %8, %cst_44 {dimension_numbers = #tpu.dot_dimension_numbers<[1], [0], [0], [1], [0, 0, 1, 1], [], []>} : vector<8x16xf32>, vector<16x64xf32>, vector<8x64xf32> -> vector<8x64xf32>
    %94 = tpu.concatenate %92, %93 in 0 : vector<8x64xf32>, vector<8x64xf32> -> vector<16x64xf32>
    %cst_45 = arith.constant dense<0.000000e+00> : vector<16x64xf32>
    %95 = tpu.matmul %1, %94, %cst_45 {dimension_numbers = #tpu.dot_dimension_numbers<[1], [0], [0], [1], [0, 0, 1, 1], [], []>} : vector<16x16xf32>, vector<16x64xf32>, vector<16x64xf32> -> vector<16x64xf32>
    %96 = arith.addf %95, %4 : vector<16x64xf32>
    %cst_46 = arith.constant 0.000000e+00 : f32
    %97 = vector.broadcast %cst_46 : f32 to vector<16x64xf32>
    %98 = arith.maximumf %96, %97 : vector<16x64xf32>
    %cst_47 = arith.constant dense<0.000000e+00> : vector<8x64xf32>
    %99 = tpu.matmul %3, %98, %cst_47 {dimension_numbers = #tpu.dot_dimension_numbers<[1], [0], [0], [1], [0, 0, 1, 1], [], []>} : vector<8x16xf32>, vector<16x64xf32>, vector<8x64xf32> -> vector<8x64xf32>
    %cst_48 = arith.constant dense<0.000000e+00> : vector<8x16xf32>
    %100 = tpu.matmul %99, %9, %cst_48 {dimension_numbers = #tpu.dot_dimension_numbers<[1], [0], [0], [1], [0, 0, 1, 1], [], []>} : vector<8x64xf32>, vector<64x16xf32>, vector<8x16xf32> -> vector<8x16xf32>
    %101 = vector.broadcast %5 : vector<8x1xf32> to vector<8x16xf32>
    %102 = arith.mulf %100, %101 : vector<8x16xf32>
    %103 = arith.addf %102, %6 : vector<8x16xf32>
    %cst_49 = arith.constant dense<0.000000e+00> : vector<8x64xf32>
    %104 = tpu.matmul %103, %10, %cst_49 {dimension_numbers = #tpu.dot_dimension_numbers<[1], [0], [0], [1], [0, 0, 1, 1], [], []>} : vector<8x16xf32>, vector<16x64xf32>, vector<8x64xf32> -> vector<8x64xf32>
    %cst_50 = arith.constant dense<0.000000e+00> : vector<8x64xf32>
    %105 = tpu.matmul %91, %11, %cst_50 {dimension_numbers = #tpu.dot_dimension_numbers<[1], [0], [0], [1], [0, 0, 1, 1], [], []>} : vector<8x16xf32>, vector<16x64xf32>, vector<8x64xf32> -> vector<8x64xf32>
    %106 = arith.addf %104, %105 : vector<8x64xf32>
    %107 = vector.broadcast %12 : vector<1x64xf32> to vector<8x64xf32>
    %108 = arith.addf %106, %107 : vector<8x64xf32>
    %109 = vector.extract_strided_slice %108 {offsets = [0, 0], sizes = [8, 16], strides = [1, 1]} : vector<8x64xf32> to vector<8x16xf32>
    %110 = arith.negf %109 : vector<8x16xf32>
    %111 = math.exp %110 : vector<8x16xf32>
    %cst_51 = arith.constant 1.000000e+00 : f32
    %112 = vector.broadcast %cst_51 : f32 to vector<8x16xf32>
    %113 = arith.addf %112, %111 : vector<8x16xf32>
    %114 = arith.divf %112, %113 : vector<8x16xf32>
    %115 = vector.extract_strided_slice %108 {offsets = [0, 16], sizes = [8, 16], strides = [1, 1]} : vector<8x64xf32> to vector<8x16xf32>
    %116 = arith.negf %115 : vector<8x16xf32>
    %117 = math.exp %116 : vector<8x16xf32>
    %cst_52 = arith.constant 1.000000e+00 : f32
    %118 = vector.broadcast %cst_52 : f32 to vector<8x16xf32>
    %119 = arith.addf %118, %117 : vector<8x16xf32>
    %120 = arith.divf %118, %119 : vector<8x16xf32>
    %121 = vector.extract_strided_slice %108 {offsets = [0, 32], sizes = [8, 16], strides = [1, 1]} : vector<8x64xf32> to vector<8x16xf32>
    %122 = vector.extract_strided_slice %108 {offsets = [0, 48], sizes = [8, 16], strides = [1, 1]} : vector<8x64xf32> to vector<8x16xf32>
    %123 = arith.mulf %114, %122 : vector<8x16xf32>
    %124 = arith.addf %121, %123 : vector<8x16xf32>
    %125 = math.tanh %124 : vector<8x16xf32>
    %cst_53 = arith.constant 1.000000e+00 : f32
    %126 = vector.broadcast %cst_53 : f32 to vector<8x16xf32>
    %127 = arith.subf %126, %120 : vector<8x16xf32>
    %128 = arith.mulf %127, %125 : vector<8x16xf32>
    %129 = arith.mulf %120, %91 : vector<8x16xf32>
    %130 = arith.addf %128, %129 : vector<8x16xf32>
    %c3_i32 = arith.constant 3 : i32
    %cst_54 = arith.constant dense<0.000000e+00> : vector<8x64xf32>
    %131 = tpu.matmul %130, %7, %cst_54 {dimension_numbers = #tpu.dot_dimension_numbers<[1], [0], [0], [1], [0, 0, 1, 1], [], []>} : vector<8x16xf32>, vector<16x64xf32>, vector<8x64xf32> -> vector<8x64xf32>
    %cst_55 = arith.constant dense<0.000000e+00> : vector<8x64xf32>
    %132 = tpu.matmul %130, %8, %cst_55 {dimension_numbers = #tpu.dot_dimension_numbers<[1], [0], [0], [1], [0, 0, 1, 1], [], []>} : vector<8x16xf32>, vector<16x64xf32>, vector<8x64xf32> -> vector<8x64xf32>
    %133 = tpu.concatenate %131, %132 in 0 : vector<8x64xf32>, vector<8x64xf32> -> vector<16x64xf32>
    %cst_56 = arith.constant dense<0.000000e+00> : vector<16x64xf32>
    %134 = tpu.matmul %1, %133, %cst_56 {dimension_numbers = #tpu.dot_dimension_numbers<[1], [0], [0], [1], [0, 0, 1, 1], [], []>} : vector<16x16xf32>, vector<16x64xf32>, vector<16x64xf32> -> vector<16x64xf32>
    %135 = arith.addf %134, %4 : vector<16x64xf32>
    %cst_57 = arith.constant 0.000000e+00 : f32
    %136 = vector.broadcast %cst_57 : f32 to vector<16x64xf32>
    %137 = arith.maximumf %135, %136 : vector<16x64xf32>
    %cst_58 = arith.constant dense<0.000000e+00> : vector<8x64xf32>
    %138 = tpu.matmul %3, %137, %cst_58 {dimension_numbers = #tpu.dot_dimension_numbers<[1], [0], [0], [1], [0, 0, 1, 1], [], []>} : vector<8x16xf32>, vector<16x64xf32>, vector<8x64xf32> -> vector<8x64xf32>
    %cst_59 = arith.constant dense<0.000000e+00> : vector<8x16xf32>
    %139 = tpu.matmul %138, %9, %cst_59 {dimension_numbers = #tpu.dot_dimension_numbers<[1], [0], [0], [1], [0, 0, 1, 1], [], []>} : vector<8x64xf32>, vector<64x16xf32>, vector<8x16xf32> -> vector<8x16xf32>
    %140 = vector.broadcast %5 : vector<8x1xf32> to vector<8x16xf32>
    %141 = arith.mulf %139, %140 : vector<8x16xf32>
    %142 = arith.addf %141, %6 : vector<8x16xf32>
    %cst_60 = arith.constant dense<0.000000e+00> : vector<8x64xf32>
    %143 = tpu.matmul %142, %10, %cst_60 {dimension_numbers = #tpu.dot_dimension_numbers<[1], [0], [0], [1], [0, 0, 1, 1], [], []>} : vector<8x16xf32>, vector<16x64xf32>, vector<8x64xf32> -> vector<8x64xf32>
    %cst_61 = arith.constant dense<0.000000e+00> : vector<8x64xf32>
    %144 = tpu.matmul %130, %11, %cst_61 {dimension_numbers = #tpu.dot_dimension_numbers<[1], [0], [0], [1], [0, 0, 1, 1], [], []>} : vector<8x16xf32>, vector<16x64xf32>, vector<8x64xf32> -> vector<8x64xf32>
    %145 = arith.addf %143, %144 : vector<8x64xf32>
    %146 = vector.broadcast %12 : vector<1x64xf32> to vector<8x64xf32>
    %147 = arith.addf %145, %146 : vector<8x64xf32>
    %148 = vector.extract_strided_slice %147 {offsets = [0, 0], sizes = [8, 16], strides = [1, 1]} : vector<8x64xf32> to vector<8x16xf32>
    %149 = arith.negf %148 : vector<8x16xf32>
    %150 = math.exp %149 : vector<8x16xf32>
    %cst_62 = arith.constant 1.000000e+00 : f32
    %151 = vector.broadcast %cst_62 : f32 to vector<8x16xf32>
    %152 = arith.addf %151, %150 : vector<8x16xf32>
    %153 = arith.divf %151, %152 : vector<8x16xf32>
    %154 = vector.extract_strided_slice %147 {offsets = [0, 16], sizes = [8, 16], strides = [1, 1]} : vector<8x64xf32> to vector<8x16xf32>
    %155 = arith.negf %154 : vector<8x16xf32>
    %156 = math.exp %155 : vector<8x16xf32>
    %cst_63 = arith.constant 1.000000e+00 : f32
    %157 = vector.broadcast %cst_63 : f32 to vector<8x16xf32>
    %158 = arith.addf %157, %156 : vector<8x16xf32>
    %159 = arith.divf %157, %158 : vector<8x16xf32>
    %160 = vector.extract_strided_slice %147 {offsets = [0, 32], sizes = [8, 16], strides = [1, 1]} : vector<8x64xf32> to vector<8x16xf32>
    %161 = vector.extract_strided_slice %147 {offsets = [0, 48], sizes = [8, 16], strides = [1, 1]} : vector<8x64xf32> to vector<8x16xf32>
    %162 = arith.mulf %153, %161 : vector<8x16xf32>
    %163 = arith.addf %160, %162 : vector<8x16xf32>
    %164 = math.tanh %163 : vector<8x16xf32>
    %cst_64 = arith.constant 1.000000e+00 : f32
    %165 = vector.broadcast %cst_64 : f32 to vector<8x16xf32>
    %166 = arith.subf %165, %159 : vector<8x16xf32>
    %167 = arith.mulf %166, %164 : vector<8x16xf32>
    %168 = arith.mulf %159, %130 : vector<8x16xf32>
    %169 = arith.addf %167, %168 : vector<8x16xf32>
    %c4_i32 = arith.constant 4 : i32
    %cst_65 = arith.constant dense<0.000000e+00> : vector<8x64xf32>
    %170 = tpu.matmul %169, %7, %cst_65 {dimension_numbers = #tpu.dot_dimension_numbers<[1], [0], [0], [1], [0, 0, 1, 1], [], []>} : vector<8x16xf32>, vector<16x64xf32>, vector<8x64xf32> -> vector<8x64xf32>
    %cst_66 = arith.constant dense<0.000000e+00> : vector<8x64xf32>
    %171 = tpu.matmul %169, %8, %cst_66 {dimension_numbers = #tpu.dot_dimension_numbers<[1], [0], [0], [1], [0, 0, 1, 1], [], []>} : vector<8x16xf32>, vector<16x64xf32>, vector<8x64xf32> -> vector<8x64xf32>
    %172 = tpu.concatenate %170, %171 in 0 : vector<8x64xf32>, vector<8x64xf32> -> vector<16x64xf32>
    %cst_67 = arith.constant dense<0.000000e+00> : vector<16x64xf32>
    %173 = tpu.matmul %1, %172, %cst_67 {dimension_numbers = #tpu.dot_dimension_numbers<[1], [0], [0], [1], [0, 0, 1, 1], [], []>} : vector<16x16xf32>, vector<16x64xf32>, vector<16x64xf32> -> vector<16x64xf32>
    %174 = arith.addf %173, %4 : vector<16x64xf32>
    %cst_68 = arith.constant 0.000000e+00 : f32
    %175 = vector.broadcast %cst_68 : f32 to vector<16x64xf32>
    %176 = arith.maximumf %174, %175 : vector<16x64xf32>
    %cst_69 = arith.constant dense<0.000000e+00> : vector<8x64xf32>
    %177 = tpu.matmul %3, %176, %cst_69 {dimension_numbers = #tpu.dot_dimension_numbers<[1], [0], [0], [1], [0, 0, 1, 1], [], []>} : vector<8x16xf32>, vector<16x64xf32>, vector<8x64xf32> -> vector<8x64xf32>
    %cst_70 = arith.constant dense<0.000000e+00> : vector<8x16xf32>
    %178 = tpu.matmul %177, %9, %cst_70 {dimension_numbers = #tpu.dot_dimension_numbers<[1], [0], [0], [1], [0, 0, 1, 1], [], []>} : vector<8x64xf32>, vector<64x16xf32>, vector<8x16xf32> -> vector<8x16xf32>
    %179 = vector.broadcast %5 : vector<8x1xf32> to vector<8x16xf32>
    %180 = arith.mulf %178, %179 : vector<8x16xf32>
    %181 = arith.addf %180, %6 : vector<8x16xf32>
    %cst_71 = arith.constant dense<0.000000e+00> : vector<8x64xf32>
    %182 = tpu.matmul %181, %10, %cst_71 {dimension_numbers = #tpu.dot_dimension_numbers<[1], [0], [0], [1], [0, 0, 1, 1], [], []>} : vector<8x16xf32>, vector<16x64xf32>, vector<8x64xf32> -> vector<8x64xf32>
    %cst_72 = arith.constant dense<0.000000e+00> : vector<8x64xf32>
    %183 = tpu.matmul %169, %11, %cst_72 {dimension_numbers = #tpu.dot_dimension_numbers<[1], [0], [0], [1], [0, 0, 1, 1], [], []>} : vector<8x16xf32>, vector<16x64xf32>, vector<8x64xf32> -> vector<8x64xf32>
    %184 = arith.addf %182, %183 : vector<8x64xf32>
    %185 = vector.broadcast %12 : vector<1x64xf32> to vector<8x64xf32>
    %186 = arith.addf %184, %185 : vector<8x64xf32>
    %187 = vector.extract_strided_slice %186 {offsets = [0, 0], sizes = [8, 16], strides = [1, 1]} : vector<8x64xf32> to vector<8x16xf32>
    %188 = arith.negf %187 : vector<8x16xf32>
    %189 = math.exp %188 : vector<8x16xf32>
    %cst_73 = arith.constant 1.000000e+00 : f32
    %190 = vector.broadcast %cst_73 : f32 to vector<8x16xf32>
    %191 = arith.addf %190, %189 : vector<8x16xf32>
    %192 = arith.divf %190, %191 : vector<8x16xf32>
    %193 = vector.extract_strided_slice %186 {offsets = [0, 16], sizes = [8, 16], strides = [1, 1]} : vector<8x64xf32> to vector<8x16xf32>
    %194 = arith.negf %193 : vector<8x16xf32>
    %195 = math.exp %194 : vector<8x16xf32>
    %cst_74 = arith.constant 1.000000e+00 : f32
    %196 = vector.broadcast %cst_74 : f32 to vector<8x16xf32>
    %197 = arith.addf %196, %195 : vector<8x16xf32>
    %198 = arith.divf %196, %197 : vector<8x16xf32>
    %199 = vector.extract_strided_slice %186 {offsets = [0, 32], sizes = [8, 16], strides = [1, 1]} : vector<8x64xf32> to vector<8x16xf32>
    %200 = vector.extract_strided_slice %186 {offsets = [0, 48], sizes = [8, 16], strides = [1, 1]} : vector<8x64xf32> to vector<8x16xf32>
    %201 = arith.mulf %192, %200 : vector<8x16xf32>
    %202 = arith.addf %199, %201 : vector<8x16xf32>
    %203 = math.tanh %202 : vector<8x16xf32>
    %cst_75 = arith.constant 1.000000e+00 : f32
    %204 = vector.broadcast %cst_75 : f32 to vector<8x16xf32>
    %205 = arith.subf %204, %198 : vector<8x16xf32>
    %206 = arith.mulf %205, %203 : vector<8x16xf32>
    %207 = arith.mulf %198, %169 : vector<8x16xf32>
    %208 = arith.addf %206, %207 : vector<8x16xf32>
    %c0_76 = arith.constant 0 : index
    %c0_77 = arith.constant 0 : index
    %209 = vector.load %arg13[%c0_76, %c0_77] : memref<64x16xf32, #tpu.memory_space<vmem>>, vector<64x16xf32>
    %210 = tpu.transpose %208, [1, 0] : vector<8x16xf32> -> vector<16x8xf32>
    %cst_78 = arith.constant dense<0.000000e+00> : vector<64x8xf32>
    %211 = tpu.matmul %209, %210, %cst_78 {dimension_numbers = #tpu.dot_dimension_numbers<[1], [0], [0], [1], [0, 0, 1, 1], [], []>} : vector<64x16xf32>, vector<16x8xf32>, vector<64x8xf32> -> vector<64x8xf32>
    %c0_79 = arith.constant 0 : index
    %c0_80 = arith.constant 0 : index
    %212 = vector.load %arg14[%c0_79, %c0_80] : memref<64x1xf32, #tpu.memory_space<vmem>>, vector<64x1xf32>
    %c0_81 = arith.constant 0 : index
    %c0_82 = arith.constant 0 : index
    %213 = vector.load %arg5[%c0_81, %c0_82] : memref<1x8xf32, #tpu.memory_space<vmem>>, vector<1x8xf32>
    %214 = vector.broadcast %212 : vector<64x1xf32> to vector<64x8xf32>
    %215 = vector.broadcast %213 : vector<1x8xf32> to vector<64x8xf32>
    %216 = arith.mulf %214, %215 : vector<64x8xf32>
    %217 = arith.addf %211, %216 : vector<64x8xf32>
    %c0_83 = arith.constant 0 : index
    %c0_84 = arith.constant 0 : index
    %218 = vector.load %arg15[%c0_83, %c0_84] : memref<64x1xf32, #tpu.memory_space<vmem>>, vector<64x1xf32>
    %219 = vector.broadcast %218 : vector<64x1xf32> to vector<64x8xf32>
    %220 = arith.addf %217, %219 : vector<64x8xf32>
    %cst_85 = arith.constant 0.000000e+00 : f32
    %221 = vector.broadcast %cst_85 : f32 to vector<64x8xf32>
    %222 = arith.maximumf %220, %221 : vector<64x8xf32>
    %c0_86 = arith.constant 0 : index
    %c0_87 = arith.constant 0 : index
    %223 = vector.load %arg16[%c0_86, %c0_87] : memref<2x64xf32, #tpu.memory_space<vmem>>, vector<2x64xf32>
    %cst_88 = arith.constant dense<0.000000e+00> : vector<2x8xf32>
    %224 = tpu.matmul %223, %222, %cst_88 {dimension_numbers = #tpu.dot_dimension_numbers<[1], [0], [0], [1], [0, 0, 1, 1], [], []>} : vector<2x64xf32>, vector<64x8xf32>, vector<2x8xf32> -> vector<2x8xf32>
    %c0_89 = arith.constant 0 : index
    %c0_90 = arith.constant 0 : index
    %225 = vector.load %arg17[%c0_89, %c0_90] : memref<2x1xf32, #tpu.memory_space<vmem>>, vector<2x1xf32>
    %226 = vector.broadcast %225 : vector<2x1xf32> to vector<2x8xf32>
    %227 = arith.addf %224, %226 : vector<2x8xf32>
    %228 = vector.extract_strided_slice %227 {offsets = [0, 0], sizes = [1, 8], strides = [1, 1]} : vector<2x8xf32> to vector<1x8xf32>
    %229 = vector.extract_strided_slice %227 {offsets = [1, 0], sizes = [1, 8], strides = [1, 1]} : vector<2x8xf32> to vector<1x8xf32>
    %230 = arith.maximumf %228, %229 : vector<1x8xf32>
    %231 = arith.subf %228, %230 : vector<1x8xf32>
    %232 = math.exp %231 : vector<1x8xf32>
    %233 = arith.subf %229, %230 : vector<1x8xf32>
    %234 = math.exp %233 : vector<1x8xf32>
    %235 = arith.addf %232, %234 : vector<1x8xf32>
    %236 = math.log %235 : vector<1x8xf32>
    %237 = arith.addf %230, %236 : vector<1x8xf32>
    %238 = vector.broadcast %237 : vector<1x8xf32> to vector<2x8xf32>
    %239 = arith.subf %227, %238 : vector<2x8xf32>
    %c0_91 = arith.constant 0 : index
    %c0_92 = arith.constant 0 : index
    %240 = vector.load %arg18[%c0_91, %c0_92] : memref<2x8xf32, #tpu.memory_space<vmem>>, vector<2x8xf32>
    tpu.vector_store %arg18[%c0_91, %c0_92], %239 {strides = array<i32>} : memref<2x8xf32, #tpu.memory_space<vmem>>, vector<2x8xf32>,
    %c0_93 = arith.constant 0 : index
    %c0_94 = arith.constant 0 : index
    %241 = vector.load %arg6[%c0_93, %c0_94] : memref<2x8xf32, #tpu.memory_space<vmem>>, vector<2x8xf32>
    %cst_95 = arith.constant 0.000000e+00 : f32
    %242 = vector.broadcast %cst_95 : f32 to vector<2x8xf32>
    %243 = arith.cmpf ogt, %241, %242 : vector<2x8xf32>
    %cst_96 = arith.constant 1.000000e+00 : f32
    %244 = vector.broadcast %cst_96 : f32 to vector<2x8xf32>
    %245 = arith.select %243, %241, %244 : vector<2x8xi1>, vector<2x8xf32>
    %cst_97 = arith.constant 0.000000e+00 : f32
    %246 = vector.broadcast %cst_97 : f32 to vector<2x8xf32>
    %247 = arith.cmpf ogt, %241, %246 : vector<2x8xf32>
    %248 = math.log %245 : vector<2x8xf32>
    %249 = arith.subf %248, %239 : vector<2x8xf32>
    %250 = arith.mulf %241, %249 : vector<2x8xf32>
    %cst_98 = arith.constant 0.000000e+00 : f32
    %251 = vector.broadcast %cst_98 : f32 to vector<2x8xf32>
    %252 = arith.select %247, %250, %251 : vector<2x8xi1>, vector<2x8xf32>
    %253 = vector.extract_strided_slice %252 {offsets = [0, 0], sizes = [1, 8], strides = [1, 1]} : vector<2x8xf32> to vector<1x8xf32>
    %254 = vector.extract_strided_slice %252 {offsets = [1, 0], sizes = [1, 8], strides = [1, 1]} : vector<2x8xf32> to vector<1x8xf32>
    %255 = arith.addf %253, %254 : vector<1x8xf32>
    %cst_99 = arith.constant dense<0.000000e+00> : vector<1xf32>
    %256 = vector.multi_reduction <add>, %255, %cst_99 [1] : vector<1x8xf32> to vector<1xf32>
    %257 = vector.shape_cast %256 : vector<1xf32> to vector<1x1xf32>
    %cst_100 = arith.constant 8.000000e+00 : f32
    %258 = vector.broadcast %cst_100 : f32 to vector<1x1xf32>
    %259 = arith.divf %257, %258 : vector<1x1xf32>
    %c0_101 = arith.constant 0 : index
    %c0_102 = arith.constant 0 : index
    %260 = vector.load %arg19[%c0_101, %c0_102] : memref<1x1xf32, #tpu.memory_space<vmem>>, vector<1x1xf32>
    tpu.vector_store %arg19[%c0_101, %c0_102], %259 {strides = array<i32>} : memref<1x1xf32, #tpu.memory_space<vmem>>, vector<1x1xf32>,
    return
  }
}

</mosaic_0001>

<bundles_post_ra>
// kernel: tpu_custom_call.1
= control target key start
LH: loop header
LB: loop body
LE: loop exit
PB: predicated region body
PF: predicated region fallthrough
CT: control target
= control target key end

     0   :  { %s4544_s0 = inlined_call_operand.vmem [shape: bf16[16,16], index: 0, kind: input, shape index: {}]   ;;  %s4545_s1 = inlined_call_operand.vmem [shape: bf16[8,16], index: 1, kind: input, shape index: {}]   ;;  %s4546_s2 = inlined_call_operand.vmem [shape: f32[16,64], index: 2, kind: input, shape index: {}]   ;;  %s4547_s3 = inlined_call_operand.vmem [shape: f32[8,1], index: 3, kind: input, shape index: {}]   ;;  %s4548_s4 = inlined_call_operand.vmem [shape: f32[8,16], index: 4, kind: input, shape index: {}]   ;;  %s4549_s5 = inlined_call_operand.vmem [shape: f32[1,8], index: 5, kind: input, shape index: {}]   ;;  %s4550_s6 = inlined_call_operand.vmem [shape: f32[2,8], index: 6, kind: input, shape index: {}]   ;;  %s4551_s7 = inlined_call_operand.vmem [shape: f32[16,64], index: 7, kind: input, shape index: {}]   ;;  %s4552_s8 = inlined_call_operand.vmem [shape: f32[16,64], index: 8, kind: input, shape index: {}]   ;;  %s4553_s9 = inlined_call_operand.vmem [shape: f32[64,16], index: 9, kind: input, shape index: {}]   ;;  %s4554_s10 = inlined_call_operand.vmem [shape: f32[16,64], index: 10, kind: input, shape index: {}]   ;;  %s4555_s11 = inlined_call_operand.vmem [shape: f32[16,64], index: 11, kind: input, shape index: {}]   ;;  %s4556_s12 = inlined_call_operand.vmem [shape: f32[1,64], index: 12, kind: input, shape index: {}]   ;;  %s4557_s13 = inlined_call_operand.vmem [shape: f32[64,16], index: 13, kind: input, shape index: {}]   ;;  %s4558_s14 = inlined_call_operand.vmem [shape: f32[64,1], index: 14, kind: input, shape index: {}]   ;;  %s4559_s15 = inlined_call_operand.vmem [shape: f32[64,1], index: 15, kind: input, shape index: {}]   ;;  %s4560_s16 = inlined_call_operand.vmem [shape: f32[2,64], index: 16, kind: input, shape index: {}]   ;;  %s4561_s17 = inlined_call_operand.vmem [shape: f32[2,1], index: 17, kind: input, shape index: {}]   ;;  %s4562_s18 = inlined_call_operand.hbm [shape: f32[2,8], index: 18, kind: output, shape index: {0}]   ;;  %s4563_s19 = inlined_call_operand.hbm [shape: f32[1,1], index: 19, kind: output, shape index: {1}]  }
   0x1   :  { %4565 = sst [smem:[#allocation8_spill]] %s4544_s0 }
   0x2   :  { %4566 = sst [smem:[#allocation9_spill]] %s4545_s1 }
   0x3   :  { %4567 = sst [smem:[#allocation10_spill]] %s4546_s2 }
   0x4   :  { %4568 = sst [smem:[#allocation11_spill]] %s4547_s3 }
   0x5   :  { %25 = vsyncpa [#allocation3], 0  ;;  %v3971_v0 = vld [vmem:[%s4551_s7 + $0x8] sm:$0xff]  ;;  %v3860_v1 = vmov 0.0   ;;  %v3977_v2 = vld [vmem:[%s4551_s7] sm:$0xff]  ;;  %vm3861_vm0 = vmmov 0  }
   0x6   :  { %3430 = vmatprep.subr.mxu0 %v3860_v1  ;;  %3434 = vmatprep.mubr.msk.f32.mxu0 %vm3861_vm0, %v3860_v1 }
   0x7   :  { %26 = vsyncpa [#allocation5], 0  ;;  %3431 = vmatpush3.msra.mxu0 %v3971_v0  ;;  %3451 = vmatprep.subr.mxu1 %v3860_v1  ;;  %v3987_v3 = vld [vmem:[%s4552_s8 + $0x8] sm:$0xff]  ;;  %v3997_v4 = vld [vmem:[%s4552_s8] sm:$0xff]  ;;  %s4569_s25 = sld [smem:[#allocation8_spill]]  ;;  %vm90_vm1 = vcmask 130048  }
   0x8   :  { %3432 = vmatprep.subr.mxu0 %v3860_v1  ;;  %3455 = vmatprep.mubr.msk.f32.mxu1 %vm3861_vm0, %v3860_v1  ;;  %v4022_v12 = vld [vmem:[%s4553_s9 + $0x38] sm:$0xff]  ;;  %v4027_v13 = vld [vmem:[%s4553_s9 + $0x30] sm:$0xff]  ;;  %v4034_v14 = vld [vmem:[%s4553_s9 + $0x28] sm:$0xff]  ;;  %s4571_s28 = sld [smem:[#allocation9_spill]]  ;;  %v3862_v33 = vmov 0   ;;  %vm390_vm2 = vcmask 523264  }
   0x9   :  { %3433 = vmatpush3.msra.mxu0 %v3977_v2  ;;  %v4041_v15 = vld [vmem:[%s4553_s9 + $0x20] sm:$0xff]  ;;  %v4048_v16 = vld [vmem:[%s4553_s9 + $0x18] sm:$0xff]  ;;  %v4055_v17 = vld [vmem:[%s4553_s9 + $0x10] sm:$0xff]  ;;  %s4572_s21 = sld [smem:[#allocation11_spill]]  ;;  %3776 = vset.pattern.permute.xlu0 %v3862_v33  ;;  %s3863_s3 = smov 80   ;;  %vm3164_vm4 = vcmask 58368  }
   0xa   :  { %3435 = vmatmul.mubr.f32.vlgmr.msra.gmra.mxu0 %v3860_v1  ;;  %3437 = vmatprep.subr.mxu0 %v3860_v1  ;;  %v4062_v18 = vld [vmem:[%s4553_s9 + $0x8] sm:$0xff]  ;;  %v4094_v29 = vld [vmem:[%s4553_s9] sm:$0xff]  ;;  %s3864_s26 = smov 32   ;;  %vm3178_vm5 = vcmask 57344  }
   0xb   :  { %3438 = vmatpush3.msra.mxu0 %v3987_v3  ;;  %3441 = vmatprep.mubr.msk.f32.mxu0 %vm3861_vm0, %v3860_v1  ;;  %v4103_v31 = vld [vmem:[%s4555_s11 + $0x8] sm:$0xff]  ;;  %v4108_v32 = vld [vmem:[%s4555_s11] sm:$0xff] }
   0xc   :  { %3439 = vmatprep.subr.mxu0 %v3860_v1  ;;  %3777 = vset.pattern.permute.xlu1 %v3862_v33  ;;  %v4123_v36 = vld [vmem:[%s4554_s10 + $0x8] sm:$0xff]  ;;  %v4130_v37 = vld [vmem:[%s4554_s10] sm:$0xff] }
   0xd   :  { %3440 = vmatpush3.msra.mxu0 %v3997_v4  ;;  %v3269_v5 = vld [vmem:[%s4569_s25] sm:$0xff]   ;;  %s4570_s25 = sld [smem:[#allocation10_spill]] }
   0xe   :  { %3442 = vmatmul.mubr.f32.vlgmr.msra.gmra.mxu0 %v3860_v1  ;;  %v4008_v6 = vunpack.c.l.bf16 %v3269_v5  ;;  %v4012_v10 = vunpack.c.h.bf16 %v3269_v5  ;;  %v67_v23 = vld [vmem:[%s4571_s28] sm:$0xf] }
   0xf   :  { %v4083_v27 = vunpack.c.l.bf16 %v67_v23  ;;  %v71_v30 = vld [vmem:[%s4572_s21] sm:$0xff] }
  0x10   :  { %3448 = vmatprep.mubr.msk.f32.mxu0 %vm90_vm1, %v4008_v6  ;;  %466 = vperm.xlu0 %3776, %v71_v30   ;;  %v4139_v41 = vld [vmem:[%s4548_s4] sm:$0xff] }
  0x11   :  { %v4153_v46 = vld [vmem:[%s4556_s12] ss:$0 sm:$0xff]  ;;  %s3865_s12 = smov 112  }
  0x13   :  { %v4071_v19 = vld [vmem:[%s4570_s25 + $0x8] sm:$0xff]  ;;  %v4076_v21 = vld [vmem:[%s4570_s25] sm:$0xff] }
  0x8b   :  { %v4134_v40 = vpop.permute.xlu0 %466 }
  0xca   :  { %v160_v7 = vpop.f32.mrf.mxu0 }
  0xcc   :  { %v3436_v8 = vpop.f32.mrf.mxu0 }
  0xce   :  { %v230_v9 = vpop.f32.mrf.mxu0 }
  0xcf   :  { %3444 = vmatprep.subr.mxu0 %v230_v9 }
  0xd0   :  { %v3443_v11 = vpop.f32.mrf.mxu0  ;;  %3445 = vmatpush3.msra.mxu0 %v230_v9 }
  0xd1   :  { %3446 = vmatprep.subr.mxu0 %v160_v7 }
  0xd2   :  { %3447 = vmatpush3.msra.mxu0 %v160_v7 }
  0xd3   :  { %3449 = vmatmul.mubr.msk.f32.vlgmr.msra.gmra.mxu0 %vm90_vm1, %v4012_v10  ;;  %3458 = vmatprep.subr.mxu0 %v3860_v1 }
  0xd4   :  { %3474 = vmatprep.mubr.msk.f32.mxu0 %vm3861_vm0, %v3860_v1  ;;  %3459 = vmatpush3.msra.mxu0 %v4022_v12 }
  0xd5   :  { %3460 = vmatprep.subr.mxu0 %v3860_v1 }
  0xd6   :  { %3461 = vmatpush3.msra.mxu0 %v4027_v13 }
  0xd7   :  { %3462 = vmatprep.subr.mxu0 %v3860_v1 }
  0xd8   :  { %3463 = vmatpush3.msra.mxu0 %v4034_v14 }
  0xd9   :  { %3464 = vmatprep.subr.mxu0 %v3860_v1 }
  0xda   :  { %3465 = vmatpush3.msra.mxu0 %v4041_v15 }
  0xdb   :  { %3466 = vmatprep.subr.mxu0 %v3860_v1 }
  0xdc   :  { %3467 = vmatpush3.msra.mxu0 %v4048_v16 }
  0xdd   :  { %3468 = vmatprep.subr.mxu0 %v3860_v1 }
  0xde   :  { %3469 = vmatpush3.msra.mxu0 %v4055_v17 }
  0xdf   :  { %3470 = vmatprep.subr.mxu0 %v3860_v1 }
  0xe0   :  { %3471 = vmatpush3.msra.mxu0 %v4062_v18 }
  0xe1   :  { %3472 = vmatprep.subr.mxu0 %v3860_v1 }
  0xe2   :  { %3473 = vmatpush3.msra.mxu0 %v4094_v29 }
 0x193   :  { %v3450_v20 = vpop.f32.mrf.mxu0 }
 0x194   :  { %v312_v22 = vadd.f32 %v3450_v20, %v4071_v19 }
 0x195   :  { %v306_v24 = vpop.f32.mrf.mxu0 }
 0x196   :  { %v316_v25 = vmax.f32 %v312_v22, 0.0  ;;  %v307_v26 = vadd.f32 %v306_v24, %v4076_v21 }
 0x198   :  { %v315_v28 = vmax.f32 %v307_v26, 0.0  ;;  %3452 = vmatpush3.msra.mxu1 %v316_v25 }
 0x199   :  { %3453 = vmatprep.subr.mxu1 %v3860_v1 }
 0x19a   :  { %3454 = vmatpush3.msra.mxu1 %v315_v28 }
 0x19b   :  { %3456 = vmatmul.mubr.msk.f32.vlgmr.msra.gmra.mxu1 %vm90_vm1, %v4083_v27  ;;  %3477 = vmatprep.subr.mxu1 %v3860_v1 }
 0x19c   :  { %3481 = vmatprep.mubr.msk.f32.mxu1 %vm3861_vm0, %v3860_v1  ;;  %3478 = vmatpush3.msra.mxu1 %v4103_v31 }
 0x19d   :  { %3479 = vmatprep.subr.mxu1 %v3860_v1 }
 0x19e   :  { %3480 = vmatpush3.msra.mxu1 %v4108_v32 }
 0x19f   :  { %3482 = vmatmul.mubr.f32.vlgmr.msra.gmra.mxu1 %v3860_v1  ;;  %3484 = vmatprep.subr.mxu1 %v3860_v1 }
 0x1a0   :  { %3488 = vmatprep.mubr.msk.f32.mxu1 %vm3861_vm0, %v3860_v1  ;;  %3485 = vmatpush3.msra.mxu1 %v4123_v36 }
 0x1a1   :  { %3486 = vmatprep.subr.mxu1 %v3860_v1 }
 0x1a2   :  { %3487 = vmatpush3.msra.mxu1 %v4130_v37 }
 0x1a3   :  { %3491 = vmatprep.subr.mxu1 %v3860_v1 }
 0x25b   :  { %v386_v34 = vpop.f32.mrf.mxu1 }
 0x25c   :  { %3475 = vmatmul.mubr.msk.f32.vlgmr.msra.gmra.mxu0 %vm390_vm2, %v386_v34 }
 0x25d   :  { %v3457_v35 = vpop.f32.mrf.mxu1  ;;  %3509 = vmatprep.mubr.msk.f32.mxu0 %vm90_vm1, %v4008_v6 }
 0x25f   :  { %v537_v38 = vpop.f32.mrf.mxu1 }
 0x261   :  { %v3483_v39 = vpop.f32.mrf.mxu1 }
 0x31c   :  { %v460_v42 = vpop.f32.mrf.mxu0 }
 0x31d   :  { %v469_v43 = vmul.f32 %v4134_v40, %v460_v42 }
 0x31e   :  { %v3476_v44 = vpop.f32.mrf.mxu0 }
 0x31f   :  { %v470_v45 = vadd.f32 %v469_v43, %v4139_v41 }
 0x321   :  { %3489 = vmatmul.mubr.msk.f32.vlgmr.msra.gmra.mxu1 %vm90_vm1, %v470_v45 }
 0x322   :  { %3492 = vmatpush3.msra.mxu1 %v3971_v0  ;;  %3495 = vmatprep.mubr.msk.f32.mxu1 %vm3861_vm0, %v3860_v1 }
 0x323   :  { %3493 = vmatprep.subr.mxu1 %v3860_v1 }
 0x324   :  { %3494 = vmatpush3.msra.mxu1 %v3977_v2 }
 0x325   :  { %3498 = vmatprep.subr.mxu1 %v3860_v1 }
 0x3e1   :  { %v610_v47 = vpop.f32.mrf.mxu1 }
 0x3e2   :  { %v611_v48 = vadd.f32 %v610_v47, %v537_v38 }
 0x3e3   :  { %v3490_v49 = vpop.f32.mrf.mxu1 }
 0x3e4   :  { %v620_v50 = vadd.f32 %v4153_v46, %v611_v48 }
 0x3e6   :  { %628 = vrot.lane.b32.xlu0 %v620_v50, %s3863_s3  ;;  %v3220_v51 = vmul.f32 -1.442695, %v620_v50 }
 0x3e8   :  { %3778 = vpow2.f32 %v3220_v51 }
 0x3f5   :  { %v3779_v52 = vpop.eup %3778 }
 0x3f6   :  { %v624_v53 = vadd.f32 1.0, %v3779_v52 }
 0x3f8   :  { %3780 = vrcp.f32 %v624_v53 }
 0x405   :  { %v3781_v54 = vpop.eup %3780 }
 0x406   :  { %v638_v60 = vsub.f32 1.0, %v3781_v54  ;;  %v644_v62 = vmul.f32 0.0, %v3781_v54 }
 0x458   :  { %v629_v55 = vpop.permute.xlu0 %628 }
 0x459   :  { %v631_v56 = vmul.f32 %v3781_v54, %v629_v55 }
 0x45b   :  { %633 = vrot.lane.b32.xlu1 %v631_v56, %s3864_s26 }
 0x4cd   :  { %v634_v57 = vpop.permute.xlu1 %633 }
 0x4ce   :  { %v636_v58 = vadd.f32 %v634_v57, %v620_v50 }
 0x4d0   :  { %3782 = vtanh.f32 %v636_v58 }
 0x4dd   :  { %v3783_v59 = vpop.eup %3782 }
 0x4de   :  { %640 = vrot.lane.b32.xlu1 %v3783_v59, %s3865_s12 }
 0x550   :  { %v641_v61 = vpop.permute.xlu1 %640 }
 0x551   :  { %v643_v63 = vmul.f32 %v641_v61, %v638_v60 }
 0x553   :  { %v4159_v5 = vadd.f32 %v644_v62, %v643_v63 }
 0x555   :  { %647 = vrot.lane.b32.xlu0 %v4159_v5, %s3865_s12 }
 0x5c7   :  { %v648_v7 = vpop.permute.xlu0 %647 }
 0x5c8   :  { %3496 = vmatmul.mubr.msk.f32.vlgmr.msra.gmra.mxu1 %vm90_vm1, %v648_v7 }
 0x5c9   :  { %3499 = vmatpush3.msra.mxu1 %v3987_v3  ;;  %3502 = vmatprep.mubr.msk.f32.mxu1 %vm3861_vm0, %v3860_v1 }
 0x5ca   :  { %3500 = vmatprep.subr.mxu1 %v3860_v1 }
 0x5cb   :  { %3501 = vmatpush3.msra.mxu1 %v3997_v4 }
 0x5cc   :  { %3503 = vmatmul.mubr.msk.f32.vlgmr.msra.gmra.mxu1 %vm90_vm1, %v648_v7  ;;  %3512 = vmatprep.subr.mxu1 %v3860_v1 }
 0x5cd   :  { %3516 = vmatprep.mubr.msk.f32.mxu1 %vm3861_vm0, %v3860_v1 }
 0x688   :  { %v717_v8 = vpop.f32.mrf.mxu1 }
 0x68a   :  { %v3497_v9 = vpop.f32.mrf.mxu1 }
 0x68c   :  { %v787_v11 = vpop.f32.mrf.mxu1 }
 0x68d   :  { %3505 = vmatprep.subr.mxu0 %v787_v11 }
 0x68e   :  { %v3504_v20 = vpop.f32.mrf.mxu1  ;;  %3506 = vmatpush3.msra.mxu0 %v787_v11 }
 0x68f   :  { %3507 = vmatprep.subr.mxu0 %v717_v8 }
 0x690   :  { %3508 = vmatpush3.msra.mxu0 %v717_v8 }
 0x691   :  { %3510 = vmatmul.mubr.msk.f32.vlgmr.msra.gmra.mxu0 %vm90_vm1, %v4012_v10  ;;  %3519 = vmatprep.subr.mxu0 %v3860_v1 }
 0x692   :  { %3520 = vmatpush3.msra.mxu0 %v4022_v12  ;;  %3535 = vmatprep.mubr.msk.f32.mxu0 %vm3861_vm0, %v3860_v1 }
 0x693   :  { %3521 = vmatprep.subr.mxu0 %v3860_v1 }
 0x694   :  { %3522 = vmatpush3.msra.mxu0 %v4027_v13 }
 0x695   :  { %3523 = vmatprep.subr.mxu0 %v3860_v1 }
 0x696   :  { %3524 = vmatpush3.msra.mxu0 %v4034_v14 }
 0x697   :  { %3525 = vmatprep.subr.mxu0 %v3860_v1 }
 0x698   :  { %3526 = vmatpush3.msra.mxu0 %v4041_v15 }
 0x699   :  { %3527 = vmatprep.subr.mxu0 %v3860_v1 }
 0x69a   :  { %3528 = vmatpush3.msra.mxu0 %v4048_v16 }
 0x69b   :  { %3529 = vmatprep.subr.mxu0 %v3860_v1 }
 0x69c   :  { %3530 = vmatpush3.msra.mxu0 %v4055_v17 }
 0x69d   :  { %3531 = vmatprep.subr.mxu0 %v3860_v1 }
 0x69e   :  { %3532 = vmatpush3.msra.mxu0 %v4062_v18 }
 0x69f   :  { %3533 = vmatprep.subr.mxu0 %v3860_v1 }
 0x6a0   :  { %3534 = vmatpush3.msra.mxu0 %v4094_v29 }
 0x751   :  { %v3511_v22 = vpop.f32.mrf.mxu0 }
 0x752   :  { %v863_v23 = vadd.f32 %v3511_v22, %v4071_v19 }
 0x753   :  { %v857_v24 = vpop.f32.mrf.mxu0 }
 0x754   :  { %v867_v25 = vmax.f32 %v863_v23, 0.0  ;;  %v858_v26 = vadd.f32 %v857_v24, %v4076_v21 }
 0x756   :  { %v866_v28 = vmax.f32 %v858_v26, 0.0  ;;  %3513 = vmatpush3.msra.mxu1 %v867_v25 }
 0x757   :  { %3514 = vmatprep.subr.mxu1 %v3860_v1 }
 0x758   :  { %3515 = vmatpush3.msra.mxu1 %v866_v28 }
 0x759   :  { %3517 = vmatmul.mubr.msk.f32.vlgmr.msra.gmra.mxu1 %vm90_vm1, %v4083_v27  ;;  %3538 = vmatprep.subr.mxu1 %v3860_v1 }
 0x75a   :  { %3539 = vmatpush3.msra.mxu1 %v4103_v31  ;;  %3542 = vmatprep.mubr.msk.f32.mxu1 %vm3861_vm0, %v3860_v1 }
 0x75b   :  { %3540 = vmatprep.subr.mxu1 %v3860_v1 }
 0x75c   :  { %3541 = vmatpush3.msra.mxu1 %v4108_v32 }
 0x75d   :  { %3543 = vmatmul.mubr.msk.f32.vlgmr.msra.gmra.mxu1 %vm90_vm1, %v648_v7  ;;  %3545 = vmatprep.subr.mxu1 %v3860_v1 }
 0x75e   :  { %3546 = vmatpush3.msra.mxu1 %v4123_v36  ;;  %3549 = vmatprep.mubr.msk.f32.mxu1 %vm3861_vm0, %v3860_v1 }
 0x75f   :  { %3547 = vmatprep.subr.mxu1 %v3860_v1 }
 0x760   :  { %3548 = vmatpush3.msra.mxu1 %v4130_v37 }
 0x761   :  { %3552 = vmatprep.subr.mxu1 %v3860_v1 }
 0x819   :  { %v934_v30 = vpop.f32.mrf.mxu1 }
 0x81a   :  { %3536 = vmatmul.mubr.msk.f32.vlgmr.msra.gmra.mxu0 %vm390_vm2, %v934_v30 }
 0x81b   :  { %v3518_v33 = vpop.f32.mrf.mxu1  ;;  %3570 = vmatprep.mubr.msk.f32.mxu0 %vm90_vm1, %v4008_v6 }
 0x81d   :  { %v1079_v34 = vpop.f32.mrf.mxu1 }
 0x81f   :  { %v3544_v35 = vpop.f32.mrf.mxu1 }
 0x8da   :  { %v1007_v38 = vpop.f32.mrf.mxu0 }
 0x8db   :  { %v1011_v39 = vmul.f32 %v1007_v38, %v4134_v40 }
 0x8dc   :  { %v3537_v42 = vpop.f32.mrf.mxu0 }
 0x8dd   :  { %v1012_v43 = vadd.f32 %v1011_v39, %v4139_v41 }
 0x8df   :  { %3550 = vmatmul.mubr.msk.f32.vlgmr.msra.gmra.mxu1 %vm90_vm1, %v1012_v43 }
 0x8e0   :  { %3553 = vmatpush3.msra.mxu1 %v3971_v0  ;;  %3556 = vmatprep.mubr.msk.f32.mxu1 %vm3861_vm0, %v3860_v1 }
 0x8e1   :  { %3554 = vmatprep.subr.mxu1 %v3860_v1 }
 0x8e2   :  { %3555 = vmatpush3.msra.mxu1 %v3977_v2 }
 0x8e3   :  { %3559 = vmatprep.subr.mxu1 %v3860_v1 }
 0x99f   :  { %v1152_v44 = vpop.f32.mrf.mxu1 }
 0x9a0   :  { %v1153_v45 = vadd.f32 %v1152_v44, %v1079_v34 }
 0x9a1   :  { %v3551_v47 = vpop.f32.mrf.mxu1 }
 0x9a2   :  { %v1156_v48 = vadd.f32 %v4153_v46, %v1153_v45 }
 0x9a4   :  { %1164 = vrot.lane.b32.xlu1 %v1156_v48, %s3863_s3  ;;  %v3229_v49 = vmul.f32 -1.442695, %v1156_v48 }
 0x9a6   :  { %3784 = vpow2.f32 %v3229_v49 }
 0x9b3   :  { %v3785_v50 = vpop.eup %3784 }
 0x9b4   :  { %v1160_v51 = vadd.f32 1.0, %v3785_v50 }
 0x9b6   :  { %3786 = vrcp.f32 %v1160_v51 }
 0x9c3   :  { %v3787_v52 = vpop.eup %3786 }
 0x9c4   :  { %v1174_v58 = vsub.f32 1.0, %v3787_v52  ;;  %v1180_v60 = vmul.f32 %v3787_v52, %v4159_v5 }
 0xa16   :  { %v1165_v53 = vpop.permute.xlu1 %1164 }
 0xa17   :  { %v1167_v54 = vmul.f32 %v3787_v52, %v1165_v53 }
 0xa19   :  { %1169 = vrot.lane.b32.xlu0 %v1167_v54, %s3864_s26 }
 0xa8b   :  { %v1170_v55 = vpop.permute.xlu0 %1169 }
 0xa8c   :  { %v1172_v56 = vadd.f32 %v1170_v55, %v1156_v48 }
 0xa8e   :  { %3788 = vtanh.f32 %v1172_v56 }
 0xa9b   :  { %v3789_v57 = vpop.eup %3788 }
 0xa9c   :  { %1176 = vrot.lane.b32.xlu1 %v3789_v57, %s3865_s12 }
 0xb0e   :  { %v1177_v59 = vpop.permute.xlu1 %1176 }
 0xb0f   :  { %v1179_v61 = vmul.f32 %v1177_v59, %v1174_v58 }
 0xb11   :  { %v4229_v62 = vadd.f32 %v1180_v60, %v1179_v61 }
 0xb13   :  { %1183 = vrot.lane.b32.xlu0 %v4229_v62, %s3865_s12 }
 0xb85   :  { %v1184_v63 = vpop.permute.xlu0 %1183 }
 0xb86   :  { %3557 = vmatmul.mubr.msk.f32.vlgmr.msra.gmra.mxu1 %vm90_vm1, %v1184_v63 }
 0xb87   :  { %3560 = vmatpush3.msra.mxu1 %v3987_v3  ;;  %3563 = vmatprep.mubr.msk.f32.mxu1 %vm3861_vm0, %v3860_v1 }
 0xb88   :  { %3561 = vmatprep.subr.mxu1 %v3860_v1 }
 0xb89   :  { %3562 = vmatpush3.msra.mxu1 %v3997_v4 }
 0xb8a   :  { %3564 = vmatmul.mubr.msk.f32.vlgmr.msra.gmra.mxu1 %vm90_vm1, %v1184_v63  ;;  %3573 = vmatprep.subr.mxu1 %v3860_v1 }
 0xb8b   :  { %3577 = vmatprep.mubr.msk.f32.mxu1 %vm3861_vm0, %v3860_v1 }
 0xc46   :  { %v1253_v5 = vpop.f32.mrf.mxu1 }
 0xc48   :  { %v3558_v7 = vpop.f32.mrf.mxu1 }
 0xc4a   :  { %v1323_v8 = vpop.f32.mrf.mxu1 }
 0xc4b   :  { %3566 = vmatprep.subr.mxu0 %v1323_v8 }
 0xc4c   :  { %v3565_v9 = vpop.f32.mrf.mxu1  ;;  %3567 = vmatpush3.msra.mxu0 %v1323_v8 }
 0xc4d   :  { %3568 = vmatprep.subr.mxu0 %v1253_v5 }
 0xc4e   :  { %3569 = vmatpush3.msra.mxu0 %v1253_v5 }
 0xc4f   :  { %3571 = vmatmul.mubr.msk.f32.vlgmr.msra.gmra.mxu0 %vm90_vm1, %v4012_v10  ;;  %3580 = vmatprep.subr.mxu0 %v3860_v1 }
 0xc50   :  { %3581 = vmatpush3.msra.mxu0 %v4022_v12  ;;  %3596 = vmatprep.mubr.msk.f32.mxu0 %vm3861_vm0, %v3860_v1 }
 0xc51   :  { %3582 = vmatprep.subr.mxu0 %v3860_v1 }
 0xc52   :  { %3583 = vmatpush3.msra.mxu0 %v4027_v13 }
 0xc53   :  { %3584 = vmatprep.subr.mxu0 %v3860_v1 }
 0xc54   :  { %3585 = vmatpush3.msra.mxu0 %v4034_v14 }
 0xc55   :  { %3586 = vmatprep.subr.mxu0 %v3860_v1 }
 0xc56   :  { %3587 = vmatpush3.msra.mxu0 %v4041_v15 }
 0xc57   :  { %3588 = vmatprep.subr.mxu0 %v3860_v1 }
 0xc58   :  { %3589 = vmatpush3.msra.mxu0 %v4048_v16 }
 0xc59   :  { %3590 = vmatprep.subr.mxu0 %v3860_v1 }
 0xc5a   :  { %3591 = vmatpush3.msra.mxu0 %v4055_v17 }
 0xc5b   :  { %3592 = vmatprep.subr.mxu0 %v3860_v1 }
 0xc5c   :  { %3593 = vmatpush3.msra.mxu0 %v4062_v18 }
 0xc5d   :  { %3594 = vmatprep.subr.mxu0 %v3860_v1 }
 0xc5e   :  { %3595 = vmatpush3.msra.mxu0 %v4094_v29 }
 0xd0f   :  { %v3572_v11 = vpop.f32.mrf.mxu0 }
 0xd10   :  { %v1399_v20 = vadd.f32 %v3572_v11, %v4071_v19 }
 0xd11   :  { %v1393_v22 = vpop.f32.mrf.mxu0 }
 0xd12   :  { %v1403_v23 = vmax.f32 %v1399_v20, 0.0  ;;  %v1394_v24 = vadd.f32 %v1393_v22, %v4076_v21 }
 0xd14   :  { %v1402_v25 = vmax.f32 %v1394_v24, 0.0  ;;  %3574 = vmatpush3.msra.mxu1 %v1403_v23 }
 0xd15   :  { %3575 = vmatprep.subr.mxu1 %v3860_v1 }
 0xd16   :  { %3576 = vmatpush3.msra.mxu1 %v1402_v25 }
 0xd17   :  { %3578 = vmatmul.mubr.msk.f32.vlgmr.msra.gmra.mxu1 %vm90_vm1, %v4083_v27  ;;  %3599 = vmatprep.subr.mxu1 %v3860_v1 }
 0xd18   :  { %3600 = vmatpush3.msra.mxu1 %v4103_v31  ;;  %3603 = vmatprep.mubr.msk.f32.mxu1 %vm3861_vm0, %v3860_v1 }
 0xd19   :  { %3601 = vmatprep.subr.mxu1 %v3860_v1 }
 0xd1a   :  { %3602 = vmatpush3.msra.mxu1 %v4108_v32 }
 0xd1b   :  { %3604 = vmatmul.mubr.msk.f32.vlgmr.msra.gmra.mxu1 %vm90_vm1, %v1184_v63  ;;  %3606 = vmatprep.subr.mxu1 %v3860_v1 }
 0xd1c   :  { %3607 = vmatpush3.msra.mxu1 %v4123_v36  ;;  %3610 = vmatprep.mubr.msk.f32.mxu1 %vm3861_vm0, %v3860_v1 }
 0xd1d   :  { %3608 = vmatprep.subr.mxu1 %v3860_v1 }
 0xd1e   :  { %3609 = vmatpush3.msra.mxu1 %v4130_v37 }
 0xd1f   :  { %3613 = vmatprep.subr.mxu1 %v3860_v1 }
 0xdd7   :  { %v1470_v26 = vpop.f32.mrf.mxu1 }
 0xdd8   :  { %3597 = vmatmul.mubr.msk.f32.vlgmr.msra.gmra.mxu0 %vm390_vm2, %v1470_v26 }
 0xdd9   :  { %v3579_v28 = vpop.f32.mrf.mxu1  ;;  %3631 = vmatprep.mubr.msk.f32.mxu0 %vm90_vm1, %v4008_v6 }
 0xddb   :  { %v1615_v30 = vpop.f32.mrf.mxu1 }
 0xddd   :  { %v3605_v33 = vpop.f32.mrf.mxu1 }
 0xe98   :  { %v1543_v34 = vpop.f32.mrf.mxu0 }
 0xe99   :  { %v1547_v35 = vmul.f32 %v1543_v34, %v4134_v40 }
 0xe9a   :  { %v3598_v38 = vpop.f32.mrf.mxu0 }
 0xe9b   :  { %v1548_v39 = vadd.f32 %v1547_v35, %v4139_v41 }
 0xe9d   :  { %3611 = vmatmul.mubr.msk.f32.vlgmr.msra.gmra.mxu1 %vm90_vm1, %v1548_v39 }
 0xe9e   :  { %3614 = vmatpush3.msra.mxu1 %v3971_v0  ;;  %3617 = vmatprep.mubr.msk.f32.mxu1 %vm3861_vm0, %v3860_v1 }
 0xe9f   :  { %3615 = vmatprep.subr.mxu1 %v3860_v1 }
 0xea0   :  { %3616 = vmatpush3.msra.mxu1 %v3977_v2 }
 0xea1   :  { %3620 = vmatprep.subr.mxu1 %v3860_v1 }
 0xf5d   :  { %v1688_v42 = vpop.f32.mrf.mxu1 }
 0xf5e   :  { %v1689_v43 = vadd.f32 %v1688_v42, %v1615_v30 }
 0xf5f   :  { %v3612_v44 = vpop.f32.mrf.mxu1 }
 0xf60   :  { %v1692_v45 = vadd.f32 %v4153_v46, %v1689_v43 }
 0xf62   :  { %1700 = vrot.lane.b32.xlu1 %v1692_v45, %s3863_s3  ;;  %v3238_v47 = vmul.f32 -1.442695, %v1692_v45 }
 0xf64   :  { %3790 = vpow2.f32 %v3238_v47 }
 0xf71   :  { %v3791_v48 = vpop.eup %3790 }
 0xf72   :  { %v1696_v49 = vadd.f32 1.0, %v3791_v48 }
 0xf74   :  { %3792 = vrcp.f32 %v1696_v49 }
 0xf81   :  { %v3793_v50 = vpop.eup %3792 }
 0xf82   :  { %v1710_v56 = vsub.f32 1.0, %v3793_v50  ;;  %v1716_v58 = vmul.f32 %v3793_v50, %v4229_v62 }
 0xfd4   :  { %v1701_v51 = vpop.permute.xlu1 %1700 }
 0xfd5   :  { %v1703_v52 = vmul.f32 %v3793_v50, %v1701_v51 }
 0xfd7   :  { %1705 = vrot.lane.b32.xlu0 %v1703_v52, %s3864_s26 }
0x1049   :  { %v1706_v53 = vpop.permute.xlu0 %1705 }
0x104a   :  { %v1708_v54 = vadd.f32 %v1706_v53, %v1692_v45 }
0x104c   :  { %3794 = vtanh.f32 %v1708_v54 }
0x1059   :  { %v3795_v55 = vpop.eup %3794 }
0x105a   :  { %1712 = vrot.lane.b32.xlu1 %v3795_v55, %s3865_s12 }
0x10cc   :  { %v1713_v57 = vpop.permute.xlu1 %1712 }
0x10cd   :  { %v1715_v59 = vmul.f32 %v1713_v57, %v1710_v56 }
0x10cf   :  { %v4299_v60 = vadd.f32 %v1716_v58, %v1715_v59 }
0x10d1   :  { %1719 = vrot.lane.b32.xlu0 %v4299_v60, %s3865_s12 }
0x1143   :  { %v1720_v61 = vpop.permute.xlu0 %1719 }
0x1144   :  { %3618 = vmatmul.mubr.msk.f32.vlgmr.msra.gmra.mxu1 %vm90_vm1, %v1720_v61 }
0x1145   :  { %3621 = vmatpush3.msra.mxu1 %v3987_v3  ;;  %3624 = vmatprep.mubr.msk.f32.mxu1 %vm3861_vm0, %v3860_v1 }
0x1146   :  { %3622 = vmatprep.subr.mxu1 %v3860_v1 }
0x1147   :  { %3623 = vmatpush3.msra.mxu1 %v3997_v4 }
0x1148   :  { %3625 = vmatmul.mubr.msk.f32.vlgmr.msra.gmra.mxu1 %vm90_vm1, %v1720_v61  ;;  %3634 = vmatprep.subr.mxu1 %v3860_v1 }
0x1149   :  { %3638 = vmatprep.mubr.msk.f32.mxu1 %vm3861_vm0, %v3860_v1 }
0x1204   :  { %v1789_v62 = vpop.f32.mrf.mxu1 }
0x1206   :  { %v3619_v63 = vpop.f32.mrf.mxu1 }
0x1208   :  { %v1859_v5 = vpop.f32.mrf.mxu1 }
0x1209   :  { %3627 = vmatprep.subr.mxu0 %v1859_v5 }
0x120a   :  { %v3626_v7 = vpop.f32.mrf.mxu1  ;;  %3628 = vmatpush3.msra.mxu0 %v1859_v5 }
0x120b   :  { %3629 = vmatprep.subr.mxu0 %v1789_v62 }
0x120c   :  { %3630 = vmatpush3.msra.mxu0 %v1789_v62 }
0x120d   :  { %3632 = vmatmul.mubr.msk.f32.vlgmr.msra.gmra.mxu0 %vm90_vm1, %v4012_v10  ;;  %3641 = vmatprep.subr.mxu0 %v3860_v1 }
0x120e   :  { %3642 = vmatpush3.msra.mxu0 %v4022_v12  ;;  %3657 = vmatprep.mubr.msk.f32.mxu0 %vm3861_vm0, %v3860_v1 }
0x120f   :  { %3643 = vmatprep.subr.mxu0 %v3860_v1 }
0x1210   :  { %3644 = vmatpush3.msra.mxu0 %v4027_v13 }
0x1211   :  { %3645 = vmatprep.subr.mxu0 %v3860_v1 }
0x1212   :  { %3646 = vmatpush3.msra.mxu0 %v4034_v14 }
0x1213   :  { %3647 = vmatprep.subr.mxu0 %v3860_v1 }
0x1214   :  { %3648 = vmatpush3.msra.mxu0 %v4041_v15 }
0x1215   :  { %3649 = vmatprep.subr.mxu0 %v3860_v1 }
0x1216   :  { %3650 = vmatpush3.msra.mxu0 %v4048_v16 }
0x1217   :  { %3651 = vmatprep.subr.mxu0 %v3860_v1 }
0x1218   :  { %3652 = vmatpush3.msra.mxu0 %v4055_v17 }
0x1219   :  { %3653 = vmatprep.subr.mxu0 %v3860_v1 }
0x121a   :  { %3654 = vmatpush3.msra.mxu0 %v4062_v18 }
0x121b   :  { %3655 = vmatprep.subr.mxu0 %v3860_v1 }
0x121c   :  { %3656 = vmatpush3.msra.mxu0 %v4094_v29 }
0x12cd   :  { %v3633_v8 = vpop.f32.mrf.mxu0 }
0x12ce   :  { %v1935_v9 = vadd.f32 %v3633_v8, %v4071_v19 }
0x12cf   :  { %v1929_v11 = vpop.f32.mrf.mxu0 }
0x12d0   :  { %v1939_v20 = vmax.f32 %v1935_v9, 0.0  ;;  %v1930_v22 = vadd.f32 %v1929_v11, %v4076_v21 }
0x12d2   :  { %v1938_v23 = vmax.f32 %v1930_v22, 0.0  ;;  %3635 = vmatpush3.msra.mxu1 %v1939_v20 }
0x12d3   :  { %3636 = vmatprep.subr.mxu1 %v3860_v1 }
0x12d4   :  { %3637 = vmatpush3.msra.mxu1 %v1938_v23 }
0x12d5   :  { %3639 = vmatmul.mubr.msk.f32.vlgmr.msra.gmra.mxu1 %vm90_vm1, %v4083_v27  ;;  %3660 = vmatprep.subr.mxu1 %v3860_v1 }
0x12d6   :  { %3661 = vmatpush3.msra.mxu1 %v4103_v31  ;;  %3664 = vmatprep.mubr.msk.f32.mxu1 %vm3861_vm0, %v3860_v1 }
0x12d7   :  { %3662 = vmatprep.subr.mxu1 %v3860_v1 }
0x12d8   :  { %3663 = vmatpush3.msra.mxu1 %v4108_v32 }
0x12d9   :  { %3665 = vmatmul.mubr.msk.f32.vlgmr.msra.gmra.mxu1 %vm90_vm1, %v1720_v61  ;;  %3667 = vmatprep.subr.mxu1 %v3860_v1 }
0x12da   :  { %3668 = vmatpush3.msra.mxu1 %v4123_v36  ;;  %3671 = vmatprep.mubr.msk.f32.mxu1 %vm3861_vm0, %v3860_v1 }
0x12db   :  { %3669 = vmatprep.subr.mxu1 %v3860_v1 }
0x12dc   :  { %3670 = vmatpush3.msra.mxu1 %v4130_v37 }
0x12dd   :  { %3674 = vmatprep.subr.mxu1 %v3860_v1 }
0x1395   :  { %v2006_v24 = vpop.f32.mrf.mxu1 }
0x1396   :  { %3658 = vmatmul.mubr.msk.f32.vlgmr.msra.gmra.mxu0 %vm390_vm2, %v2006_v24 }
0x1397   :  { %v3640_v25 = vpop.f32.mrf.mxu1  ;;  %3692 = vmatprep.mubr.msk.f32.mxu0 %vm90_vm1, %v4008_v6 }
0x1398   :  { %v2804_v25 = vld [vmem:[%s4558_s14 + $0x30] sm:$0xff] }
0x1399   :  { %v2151_v26 = vpop.f32.mrf.mxu1 }
0x139b   :  { %v3666_v28 = vpop.f32.mrf.mxu1 }
0x139c   :  { %v3001_v28 = vld [vmem:[%s4559_s15 + $0x30] sm:$0xff] }
0x1456   :  { %v2079_v30 = vpop.f32.mrf.mxu0 }
0x1457   :  { %v2083_v33 = vmul.f32 %v2079_v30, %v4134_v40  ;;  %v3000_v30 = vld [vmem:[%s4559_s15 + $0x28] sm:$0xff] }
0x1458   :  { %v3659_v34 = vpop.f32.mrf.mxu0 }
0x1459   :  { %v2084_v35 = vadd.f32 %v2083_v33, %v4139_v41  ;;  %v2999_v33 = vld [vmem:[%s4559_s15 + $0x20] sm:$0xff]  ;;  %v2998_v34 = vld [vmem:[%s4559_s15 + $0x18] sm:$0xff] }
0x145b   :  { %3672 = vmatmul.mubr.msk.f32.vlgmr.msra.gmra.mxu1 %vm90_vm1, %v2084_v35  ;;  %v2805_v35 = vld [vmem:[%s4558_s14 + $0x38] sm:$0xff] }
0x145c   :  { %3675 = vmatpush3.msra.mxu1 %v3971_v0  ;;  %3678 = vmatprep.mubr.msk.f32.mxu1 %vm3861_vm0, %v3860_v1 }
0x145d   :  { %3676 = vmatprep.subr.mxu1 %v3860_v1 }
0x145e   :  { %3677 = vmatpush3.msra.mxu1 %v3977_v2 }
0x145f   :  { %3681 = vmatprep.subr.mxu1 %v3860_v1 }
0x151b   :  { %v2224_v6 = vpop.f32.mrf.mxu1 }
0x151c   :  { %v2225_v38 = vadd.f32 %v2224_v6, %v2151_v26  ;;  %v3002_v26 = vld [vmem:[%s4559_s15 + $0x38] sm:$0xff]  ;;  %v2997_v6 = vld [vmem:[%s4559_s15 + $0x10] sm:$0xff] }
0x151d   :  { %v3673_v39 = vpop.f32.mrf.mxu1 }
0x151e   :  { %v2228_v42 = vadd.f32 %v4153_v46, %v2225_v38  ;;  %v2803_v38 = vld [vmem:[%s4558_s14 + $0x28] sm:$0xff]  ;;  %v2995_v39 = vld [vmem:[%s4559_s15] sm:$0xff] }
0x1520   :  { %2236 = vrot.lane.b32.xlu1 %v2228_v42, %s3863_s3  ;;  %v3247_v43 = vmul.f32 -1.442695, %v2228_v42 }
0x1522   :  { %3796 = vpow2.f32 %v3247_v43  ;;  %v2801_v43 = vld [vmem:[%s4558_s14 + $0x18] sm:$0xff] }
0x152f   :  { %v3797_v44 = vpop.eup %3796 }
0x1530   :  { %v2232_v0 = vadd.f32 1.0, %v3797_v44  ;;  %v2800_v44 = vld [vmem:[%s4558_s14 + $0x10] sm:$0xff] }
0x1532   :  { %3798 = vrcp.f32 %v2232_v0  ;;  %v2799_v0 = vld [vmem:[%s4558_s14 + $0x8] sm:$0xff] }
0x153f   :  { %v3799_v45 = vpop.eup %3798 }
0x1540   :  { %v2246_v51 = vsub.f32 1.0, %v3799_v45  ;;  %v2252_v53 = vmul.f32 %v3799_v45, %v4299_v60 }
0x1592   :  { %v2237_v47 = vpop.permute.xlu1 %2236 }
0x1593   :  { %v2239_v48 = vmul.f32 %v3799_v45, %v2237_v47  ;;  %v2798_v45 = vld [vmem:[%s4558_s14] sm:$0xff]  ;;  %v2996_v47 = vld [vmem:[%s4559_s15 + $0x8] sm:$0xff] }
0x1595   :  { %2241 = vrot.lane.b32.xlu0 %v2239_v48, %s3864_s26  ;;  %v3060_v48 = vld [vmem:[%s4561_s17] sm:$0x3] }
0x1607   :  { %v2242_v2 = vpop.permute.xlu0 %2241 }
0x1608   :  { %v2244_v49 = vadd.f32 %v2242_v2, %v2228_v42  ;;  %v2802_v42 = vld [vmem:[%s4558_s14 + $0x20] sm:$0xff] }
0x160a   :  { %3800 = vtanh.f32 %v2244_v49  ;;  %v2791_v49 = vld [vmem:[%s4557_s13 + $0x8] sm:$0xff] }
0x1617   :  { %v3801_v50 = vpop.eup %3800 }
0x1618   :  { %2248 = vrot.lane.b32.xlu1 %v3801_v50, %s3865_s12  ;;  %v2792_v50 = vld [vmem:[%s4557_s13 + $0x10] sm:$0xff] }
0x168a   :  { %v2249_v52 = vpop.permute.xlu1 %2248 }
0x168b   :  { %v2251_v54 = vmul.f32 %v2249_v52, %v2246_v51  ;;  %v2793_v51 = vld [vmem:[%s4557_s13 + $0x18] sm:$0xff]  ;;  %v2794_v52 = vld [vmem:[%s4557_s13 + $0x20] sm:$0xff] }
0x168d   :  { %v4369_v55 = vadd.f32 %v2252_v53, %v2251_v54  ;;  %v2795_v53 = vld [vmem:[%s4557_s13 + $0x28] sm:$0xff]  ;;  %v2796_v54 = vld [vmem:[%s4557_s13 + $0x30] sm:$0xff] }
0x168f   :  { %2255 = vrot.lane.b32.xlu0 %v4369_v55, %s3865_s12 }
0x1701   :  { %v2256_v56 = vpop.permute.xlu0 %2255 }
0x1702   :  { %3679 = vmatmul.mubr.msk.f32.vlgmr.msra.gmra.mxu1 %vm90_vm1, %v2256_v56 }
0x1703   :  { %3682 = vmatpush3.msra.mxu1 %v3987_v3  ;;  %3685 = vmatprep.mubr.msk.f32.mxu1 %vm3861_vm0, %v3860_v1 }
0x1704   :  { %3683 = vmatprep.subr.mxu1 %v3860_v1 }
0x1705   :  { %3684 = vmatpush3.msra.mxu1 %v3997_v4 }
0x1706   :  { %3686 = vmatmul.mubr.msk.f32.vlgmr.msra.gmra.mxu1 %vm90_vm1, %v2256_v56  ;;  %3695 = vmatprep.subr.mxu1 %v3860_v1 }
0x1707   :  { %3699 = vmatprep.mubr.msk.f32.mxu1 %vm3861_vm0, %v3860_v1 }
0x17c2   :  { %v2325_v57 = vpop.f32.mrf.mxu1 }
0x17c4   :  { %v3680_v58 = vpop.f32.mrf.mxu1 }
0x17c6   :  { %v2395_v59 = vpop.f32.mrf.mxu1 }
0x17c7   :  { %3688 = vmatprep.subr.mxu0 %v2395_v59 }
0x17c8   :  { %v3687_v60 = vpop.f32.mrf.mxu1  ;;  %3689 = vmatpush3.msra.mxu0 %v2395_v59 }
0x17c9   :  { %3690 = vmatprep.subr.mxu0 %v2325_v57 }
0x17ca   :  { %3691 = vmatpush3.msra.mxu0 %v2325_v57 }
0x17cb   :  { %3693 = vmatmul.mubr.msk.f32.vlgmr.msra.gmra.mxu0 %vm90_vm1, %v4012_v10  ;;  %3702 = vmatprep.subr.mxu0 %v3860_v1 }
0x17cc   :  { %3703 = vmatpush3.msra.mxu0 %v4022_v12  ;;  %3718 = vmatprep.mubr.msk.f32.mxu0 %vm3861_vm0, %v3860_v1 }
0x17cd   :  { %3704 = vmatprep.subr.mxu0 %v3860_v1 }
0x17ce   :  { %3705 = vmatpush3.msra.mxu0 %v4027_v13 }
0x17cf   :  { %3706 = vmatprep.subr.mxu0 %v3860_v1 }
0x17d0   :  { %3707 = vmatpush3.msra.mxu0 %v4034_v14 }
0x17d1   :  { %3708 = vmatprep.subr.mxu0 %v3860_v1 }
0x17d2   :  { %3709 = vmatpush3.msra.mxu0 %v4041_v15 }
0x17d3   :  { %3710 = vmatprep.subr.mxu0 %v3860_v1 }
0x17d4   :  { %3711 = vmatpush3.msra.mxu0 %v4048_v16 }
0x17d5   :  { %3712 = vmatprep.subr.mxu0 %v3860_v1 }
0x17d6   :  { %3713 = vmatpush3.msra.mxu0 %v4055_v17 }
0x17d7   :  { %3714 = vmatprep.subr.mxu0 %v3860_v1 }
0x17d8   :  { %3715 = vmatpush3.msra.mxu0 %v4062_v18 }
0x17d9   :  { %3716 = vmatprep.subr.mxu0 %v3860_v1 }
0x17da   :  { %3717 = vmatpush3.msra.mxu0 %v4094_v29 }
0x188b   :  { %v3694_v3 = vpop.f32.mrf.mxu0 }
0x188c   :  { %v2471_v4 = vadd.f32 %v3694_v3, %v4071_v19 }
0x188d   :  { %v2465_v10 = vpop.f32.mrf.mxu0 }
0x188e   :  { %v2475_v12 = vmax.f32 %v2471_v4, 0.0  ;;  %v2466_v13 = vadd.f32 %v2465_v10, %v4076_v21 }
0x1890   :  { %v2474_v14 = vmax.f32 %v2466_v13, 0.0  ;;  %3696 = vmatpush3.msra.mxu1 %v2475_v12 }
0x1891   :  { %3697 = vmatprep.subr.mxu1 %v3860_v1 }
0x1892   :  { %3698 = vmatpush3.msra.mxu1 %v2474_v14 }
0x1893   :  { %3700 = vmatmul.mubr.msk.f32.vlgmr.msra.gmra.mxu1 %vm90_vm1, %v4083_v27  ;;  %3721 = vmatprep.subr.mxu1 %v3860_v1 }
0x1894   :  { %3722 = vmatpush3.msra.mxu1 %v4103_v31  ;;  %3725 = vmatprep.mubr.msk.f32.mxu1 %vm3861_vm0, %v3860_v1 }
0x1895   :  { %3723 = vmatprep.subr.mxu1 %v3860_v1 }
0x1896   :  { %3724 = vmatpush3.msra.mxu1 %v4108_v32 }
0x1897   :  { %3726 = vmatmul.mubr.msk.f32.vlgmr.msra.gmra.mxu1 %vm90_vm1, %v2256_v56  ;;  %3728 = vmatprep.subr.mxu1 %v3860_v1 }
0x1898   :  { %3729 = vmatpush3.msra.mxu1 %v4123_v36  ;;  %3732 = vmatprep.mubr.msk.f32.mxu1 %vm3861_vm0, %v3860_v1 }
0x1899   :  { %3730 = vmatprep.subr.mxu1 %v3860_v1 }
0x189a   :  { %3731 = vmatpush3.msra.mxu1 %v4130_v37 }
0x1953   :  { %v2542_v15 = vpop.f32.mrf.mxu1 }
0x1954   :  { %3719 = vmatmul.mubr.msk.f32.vlgmr.msra.gmra.mxu0 %vm390_vm2, %v2542_v15 }
0x1955   :  { %v3701_v16 = vpop.f32.mrf.mxu1 }
0x1957   :  { %v2687_v17 = vpop.f32.mrf.mxu1 }
0x1959   :  { %v3727_v18 = vpop.f32.mrf.mxu1 }
0x1a14   :  { %v2615_v19 = vpop.f32.mrf.mxu0 }
0x1a15   :  { %v2619_v21 = vmul.f32 %v2615_v19, %v4134_v40  ;;  %v3257_v19 = vld [vmem:[%s4549_s5] ss:$0 sm:$0xff] }
0x1a16   :  { %v3720_v27 = vpop.f32.mrf.mxu0 }
0x1a17   :  { %v2620_v29 = vadd.f32 %v2619_v21, %v4139_v41 }
0x1a19   :  { %3733 = vmatmul.mubr.msk.f32.vlgmr.msra.gmra.mxu1 %vm90_vm1, %v2620_v29 }
0x1ad9   :  { %v2760_v31 = vpop.f32.mrf.mxu1 }
0x1ada   :  { %v2761_v32 = vadd.f32 %v2760_v31, %v2687_v17 }
0x1adb   :  { %v3734_v36 = vpop.f32.mrf.mxu1 }
0x1adc   :  { %v2764_v61 = vadd.f32 %v4153_v46, %v2761_v32  ;;  %v2790_v46 = vld [vmem:[%s4557_s13] sm:$0xff] }
0x1add   :  { %3737 = vmatprep.mubr.msk.f32.mxu1 %vm90_vm1, %v2790_v46 }
0x1ade   :  { %2772 = vrot.lane.b32.xlu1 %v2764_v61, %s3863_s3  ;;  %v3256_v37 = vmul.f32 -1.442695, %v2764_v61 }
0x1ae0   :  { %3802 = vpow2.f32 %v3256_v37 }
0x1aed   :  { %v3803_v62 = vpop.eup %3802 }
0x1aee   :  { %v2768_v63 = vadd.f32 1.0, %v3803_v62 }
0x1af0   :  { %3804 = vrcp.f32 %v2768_v63 }
0x1afd   :  { %v3805_v5 = vpop.eup %3804 }
0x1afe   :  { %v2782_v11 = vsub.f32 1.0, %v3805_v5  ;;  %v2788_v22 = vmul.f32 %v3805_v5, %v4369_v55  ;;  %v2797_v55 = vld [vmem:[%s4557_s13 + $0x38] sm:$0xff] }
0x1b50   :  { %v2773_v7 = vpop.permute.xlu1 %2772 }
0x1b51   :  { %v2775_v40 = vmul.f32 %v3805_v5, %v2773_v7 }
0x1b53   :  { %2777 = vrot.lane.b32.xlu0 %v2775_v40, %s3864_s26 }
0x1bc5   :  { %v2778_v41 = vpop.permute.xlu0 %2777 }
0x1bc6   :  { %v2780_v8 = vadd.f32 %v2778_v41, %v2764_v61 }
0x1bc8   :  { %3806 = vtanh.f32 %v2780_v8 }
0x1bd5   :  { %v3807_v9 = vpop.eup %3806 }
0x1bd6   :  { %2784 = vrot.lane.b32.xlu1 %v3807_v9, %s3865_s12 }
0x1bda   :  { %2844 = vperm.xlu1 %3777, %v2805_v35  }
0x1bde   :  { %2834 = vperm.xlu1 %3777, %v2803_v38  }
0x1be2   :  { %2829 = vperm.xlu1 %3777, %v2802_v42  }
0x1be6   :  { %2824 = vperm.xlu1 %3777, %v2801_v43  }
0x1bea   :  { %2819 = vperm.xlu1 %3777, %v2800_v44  }
0x1bee   :  { %2814 = vperm.xlu1 %3777, %v2799_v0  }
0x1bf2   :  { %2809 = vperm.xlu1 %3777, %v2798_v45  }
0x1bf6   :  { %3010 = vperm.xlu1 %3777, %v2996_v47  }
0x1bfa   :  { %3063 = vperm.xlu1 %3777, %v3060_v48  }
0x1c48   :  { %v2785_v20 = vpop.permute.xlu1 %2784 }
0x1c49   :  { %v2787_v23 = vmul.f32 %v2785_v20, %v2782_v11 }
0x1c4b   :  { %v2789_v24 = vadd.f32 %v2788_v22, %v2787_v23 }
0x1c4d   :  { %2862 = vrot.lane.b32.xlu0 %v2789_v24, %s3865_s12 }
0x1c51   :  { %2839 = vperm.xlu0 %3776, %v2804_v25  }
0x1c55   :  { %3040 = vperm.xlu0 %3776, %v3002_v26   ;;  %v2845_v56 = vpop.permute.xlu1 %2844 }
0x1c56   :  { %v2860_v27 = vmul.f32 %v3257_v19, %v2845_v56 }
0x1c59   :  { %3035 = vperm.xlu0 %3776, %v3001_v28   ;;  %v2835_v58 = vpop.permute.xlu1 %2834 }
0x1c5a   :  { %v2858_v29 = vmul.f32 %v3257_v19, %v2835_v58 }
0x1c5d   :  { %3030 = vperm.xlu0 %3776, %v3000_v30   ;;  %v2830_v60 = vpop.permute.xlu1 %2829 }
0x1c5e   :  { %v2857_v61 = vmul.f32 %v3257_v19, %v2830_v60 }
0x1c61   :  { %3025 = vperm.xlu0 %3776, %v2999_v33   ;;  %v2825_v4 = vpop.permute.xlu1 %2824 }
0x1c62   :  { %v2856_v7 = vmul.f32 %v3257_v19, %v2825_v4 }
0x1c65   :  { %3020 = vperm.xlu0 %3776, %v2998_v34   ;;  %v2820_v15 = vpop.permute.xlu1 %2819 }
0x1c66   :  { %v2855_v9 = vmul.f32 %v3257_v19, %v2820_v15  ;;  %v3159_v15 = vlaneseq }
0x1c69   :  { %3015 = vperm.xlu0 %3776, %v2997_v6   ;;  %v2815_v31 = vpop.permute.xlu1 %2814 }
0x1c6a   :  { %v2854_v46 = vmul.f32 %v3257_v19, %v2815_v31 }
0x1c6d   :  { %3005 = vperm.xlu0 %3776, %v2995_v39   ;;  %v2810_v24 = vpop.permute.xlu1 %2809 }
0x1c6e   :  { %v2853_v33 = vmul.f32 %v3257_v19, %v2810_v24 }
0x1c71   :  { %v3011_v43 = vpop.permute.xlu1 %3010 }
0x1cbf   :  { %v2863_v2 = vpop.permute.xlu0 %2862 }
0x1cc0   :  { %3735 = vmatprep.subr.msk.mxu1 %vm90_vm1, %v2863_v2 }
0x1cc1   :  { %3736 = vmatpush3.xpose.msk.msra.mxu1 %vm90_vm1, %v2863_v2 }
0x1cc2   :  { %3749 = vmatprep.subr.mxu1 %v3860_v1 }
0x1cc4   :  { %3738 = vmatmul.mubr.msk.f32.vlgmr.msra.gmra.mxu1 %vm90_vm1, %v2791_v49 }
0x1cc5   :  { %3740 = vmatprep.mubr.msk.f32.mxu1 %vm90_vm1, %v2792_v50  ;;  %v3059_v50 = vld [vmem:[%s4560_s16] sm:$0x3] }
0x1cc8   :  { %3741 = vmatmul.mubr.msk.f32.gmra.mxu1 %vm90_vm1, %v2793_v51  ;;  %v3064_v51 = vpop.permute.xlu1 %3063 }
0x1cc9   :  { %3743 = vmatprep.mubr.msk.f32.mxu1 %vm90_vm1, %v2794_v52 }
0x1ccc   :  { %3744 = vmatmul.mubr.msk.f32.gmra.mxu1 %vm90_vm1, %v2795_v53  ;;  %v2840_v57 = vpop.permute.xlu0 %2839 }
0x1ccd   :  { %3746 = vmatprep.mubr.msk.f32.mxu1 %vm90_vm1, %v2796_v54  ;;  %v2859_v36 = vmul.f32 %v3257_v19, %v2840_v57 }
0x1cd0   :  { %3747 = vmatmul.mubr.msk.f32.gmra.mxu1 %vm90_vm1, %v2797_v55  ;;  %v3041_v59 = vpop.permute.xlu0 %3040 }
0x1cd1   :  { %3765 = vmatprep.mubr.msk.f32.mxu1 %vm3861_vm0, %v3860_v1 }
0x1cd4   :  { %v3036_v3 = vpop.permute.xlu0 %3035 }
0x1cd8   :  { %v3031_v12 = vpop.permute.xlu0 %3030 }
0x1cdc   :  { %v3026_v17 = vpop.permute.xlu0 %3025 }
0x1ce0   :  { %v3021_v63 = vpop.permute.xlu0 %3020 }
0x1ce4   :  { %v3016_v30 = vpop.permute.xlu0 %3015 }
0x1ce8   :  { %v3006_v45 = vpop.permute.xlu0 %3005 }
0x1d84   :  { %v3739_v10 = vpop.f32.mrf.mxu1 }
0x1d85   :  { %v2962_v34 = vadd.f32 %v3739_v10, %v2854_v46 }
0x1d86   :  { %v2956_v13 = vpop.f32.mrf.mxu1 }
0x1d87   :  { %v2957_v38 = vadd.f32 %v2956_v13, %v2853_v33  ;;  %v3044_v44 = vadd.f32 %v3011_v43, %v2962_v34 }
0x1d88   :  { %v3742_v14 = vpop.f32.mrf.mxu1 }
0x1d89   :  { %v2972_v11 = vadd.f32 %v3742_v14, %v2856_v7  ;;  %v3043_v47 = vadd.f32 %v3006_v45, %v2957_v38  ;;  %v3052_v2 = vmax.f32 %v3044_v44, 0.0 }
0x1d8a   :  { %v2966_v16 = vpop.f32.mrf.mxu1 }
0x1d8b   :  { %v2967_v25 = vadd.f32 %v2966_v16, %v2855_v9  ;;  %v3046_v35 = vadd.f32 %v3021_v63, %v2972_v11  ;;  %v3051_v49 = vmax.f32 %v3043_v47, 0.0  ;;  %v3160_v16 = vshrl.u32 %v3159_v15, 7 }
0x1d8c   :  { %v3745_v18 = vpop.f32.mrf.mxu1 }
0x1d8d   :  { %v2982_v37 = vadd.f32 %v3745_v18, %v2858_v29  ;;  %v3045_v39 = vadd.f32 %v3016_v30, %v2967_v25  ;;  %v3054_v0 = vmax.f32 %v3046_v35, 0.0  ;;  %v3161_v19 = vsub.s32 0, %v3160_v16 }
0x1d8e   :  { %v2976_v21 = vpop.f32.mrf.mxu1 }
0x1d8f   :  { %v2977_v40 = vadd.f32 %v2976_v21, %v2857_v61  ;;  %v3048_v20 = vadd.f32 %v3031_v12, %v2982_v37  ;;  %v3053_v48 = vmax.f32 %v3045_v39, 0.0 }
0x1d90   :  { %v3748_v32 = vpop.f32.mrf.mxu1 }
0x1d91   :  { %v2992_v62 = vadd.f32 %v3748_v32, %v2860_v27  ;;  %v3047_v26 = vadd.f32 %v3026_v17, %v2977_v40  ;;  %v3056_v6 = vmax.f32 %v3048_v20, 0.0 }
0x1d92   :  { %v2986_v5 = vpop.f32.mrf.mxu1 }
0x1d93   :  { %v3050_v41 = vadd.f32 %v3041_v59, %v2992_v62  ;;  %v2987_v8 = vadd.f32 %v2986_v5, %v2859_v36  ;;  %v3055_v42 = vmax.f32 %v3047_v26, 0.0 }
0x1d95   :  { %v3058_v22 = vmax.f32 %v3050_v41, 0.0  ;;  %v3049_v23 = vadd.f32 %v3036_v3, %v2987_v8 }
0x1d97   :  { %v3057_v28 = vmax.f32 %v3049_v23, 0.0  ;;  %3750 = vmatpush3.msra.mxu1 %v3058_v22 }
0x1d98   :  { %3751 = vmatprep.subr.mxu1 %v3860_v1 }
0x1d99   :  { %3752 = vmatpush3.msra.mxu1 %v3057_v28 }
0x1d9a   :  { %3753 = vmatprep.subr.mxu1 %v3860_v1 }
0x1d9b   :  { %3754 = vmatpush3.msra.mxu1 %v3056_v6 }
0x1d9c   :  { %3755 = vmatprep.subr.mxu1 %v3860_v1 }
0x1d9d   :  { %3756 = vmatpush3.msra.mxu1 %v3055_v42 }
0x1d9e   :  { %3757 = vmatprep.subr.mxu1 %v3860_v1 }
0x1d9f   :  { %3758 = vmatpush3.msra.mxu1 %v3054_v0 }
0x1da0   :  { %3759 = vmatprep.subr.mxu1 %v3860_v1 }
0x1da1   :  { %3760 = vmatpush3.msra.mxu1 %v3053_v48 }
0x1da2   :  { %3761 = vmatprep.subr.mxu1 %v3860_v1 }
0x1da3   :  { %3762 = vmatpush3.msra.mxu1 %v3052_v2 }
0x1da4   :  { %3763 = vmatprep.subr.mxu1 %v3860_v1  ;;  %v3166_v1 = vld [vmem:[%s4550_s6] sm:$0x3]  ;;  %s3866_s6 = smov [#allocation2]  }
0x1da5   :  { %3764 = vmatpush3.msra.mxu1 %v3051_v49  ;;  %vm3167_vm3 = vcmp.gt.f32.partialorder %v3166_v1, 0.0  ;;  %s3192_s21 = sshll.u32 %s3866_s6, 4  ;;  %s3193_s21 = int_to_ptr.vmem [resolvable:$true] %s3192_s21 }
0x1da6   :  { %3766 = vmatmul.mubr.msk.f32.vlgmr.msra.gmra.mxu1 %vm390_vm2, %v3059_v50  ;;  %v3168_v14 = vsel %vm3167_vm3, %v3166_v1, 1.0  ;;  %s3816_s1 = scalar_lea.vmem %s3193_s21, 32  ;;  %p3821_p1 = scmp.lt.s32.totalorder %s3193_s21, %s3193_s21 }
0x1da7   :  { %p3817_p0 = scmp.ne.s32.totalorder %s3193_s21, %s3816_s1  ;;  %p3822_p2 = scmp.lt.s32.totalorder %s3816_s1, %s3816_s1 }
0x1da9   :  { %p3823_p3 = por %p3822_p2, %p3821_p1 }
0x1dab   :  { %p3824_p4 = pnand %p3823_p3, %p3817_p0 }
0x1e66   :  { %v3135_v52 = vpop.f32.mrf.mxu1 }
0x1e67   :  { %v3136_v53 = vadd.f32 %v3135_v52, %v3064_v51 }
0x1e68   :  { %v3767_v54 = vpop.f32.mrf.mxu1 }
0x1e69   :  { %v3140_v55 = vrot.slane %v3136_v53, 1 }
0x1e6b   :  { %v3142_v56 = vmax.f32 %v3136_v53, %v3140_v55 }
0x1e6d   :  { %v3143_v57 = vsub.f32 %v3136_v53, %v3142_v56  ;;  %v3147_v58 = vrot.slane %v3142_v56, 7 }
0x1e6f   :  { %v3149_v59 = vsub.f32 %v3136_v53, %v3147_v58  ;;  %v3144_v60 = vmul.f32 1.442695, %v3143_v57 }
0x1e71   :  { %v3150_v3 = vmul.f32 1.442695, %v3149_v59 }
0x1e73   :  { %3808 = vpow2.f32 %v3150_v3 }
0x1e74   :  { %3810 = vpow2.f32 %v3144_v60 }
0x1e80   :  { %v3809_v4 = vpop.eup %3808 }
0x1e81   :  { %v3153_v10 = vrot.slane %v3809_v4, 1  ;;  %v3811_v12 = vpop.eup %3810 }
0x1e83   :  { %v3155_v13 = vadd.f32 %v3811_v12, %v3153_v10 }
0x1e85   :  { %3812 = vlog2.f32 %v3155_v13 }
0x1e86   :  { %3814 = vlog2.f32 %v3168_v14 }
0x1e92   :  { %v3813_v17 = vpop.eup %3812 }
0x1e93   :  { %v3157_v18 = vmul.f32 0.6931472, %v3813_v17  ;;  %v3815_v21 = vpop.eup %3814 }
0x1e94   :  { %v3170_v31 = vmul.f32 0.6931472, %v3815_v21 }
0x1e95   :  { %v3158_v27 = vadd.f32 %v3157_v18, %v3142_v56 }
0x1e97   :  { %v3162_v29 = vrot.slane %v3158_v27, %v3161_v19 }
0x1e99   :  { %v3163_v32 = vsub.f32 %v3136_v53, %v3162_v29 }
0x1e9b   :  { %v3171_v36 = vsub.f32 %v3170_v31, %v3163_v32  ;;  %3165 = vst.msk [vmem:[#allocation2] sm:$0x3] %vm3164_vm4, %v3163_v32 }
0x1e9d   :  { %v3172_v61 = vmul.f32 %v3171_v36, %v3166_v1 }
0x1e9f   :  { %v3173_v37 = vsel %vm3167_vm3, %v3172_v61, 0.0 }
0x1ea0   :  { %v3175_v62 = vrot.slane %v3173_v37, 1 }
0x1ea2   :  { %v3177_v63 = vadd.f32 %v3175_v62, %v3173_v37 }
0x1ea4   :  { %v3179_v5 = vsel %vm3178_vm5, %v3177_v63, 0.0 }
0x1ea5   :  { %3180 = vadd.xlane.f32.xlu0 %v3179_v5 }
0x1ea6   :  { %3827 = shalt.err (!%p3824_p4)
}
0x1ea7   :  { %3195 = dma.vmem_to_hbm [thread:$0]  %s3193_s21, 32, %s4562_s18, [#allocation3]   ;;  %vm3184_vm6 = vcmask 0  }
0x1ea8   :  { %s3867_s2 = smov [#allocation4]  }
0x1ea9   :  { %s3202_s9 = sshll.u32 %s3867_s2, 4  ;;  %s3203_s9 = int_to_ptr.vmem [resolvable:$true] %s3202_s9 }
0x1eaa   :  { %s3836_s11 = scalar_lea.vmem %s3203_s9, 16  ;;  %s3840_s23 = scalar_lea.vmem %s3203_s9, 32 }
0x1eab   :  { %p3837_p5 = scmp.ne.s32.totalorder %s3203_s9, %s3836_s11  ;;  %p3841_p6 = scmp.lt.s32.totalorder %s3203_s9, %s3203_s9 }
0x1eac   :  { %p3842_p7 = scmp.lt.s32.totalorder %s3840_s23, %s3836_s11 }
0x1eae   :  { %p3843_p8 = por %p3842_p7, %p3841_p6 }
0x1eb0   :  { %p3844_p9 = pnand %p3843_p8, %p3837_p5 }
0x1f2e   :  { %v3181_v7 = vpop.xlane.xlu0 %3180 }
0x1f2f   :  { %v3183_v40 = vmul.f32 0.125, %v3181_v7 }
0x1f31   :  { %3185 = vst.msk [vmem:[#allocation4] sm:$0x1] %vm3184_vm6, %v3183_v40 }
0x1f32   :  { %3847 = shalt.err (!%p3844_p9)
}
0x1f33   :  { %3205 = dma.vmem_to_hbm [thread:$0]  %s3203_s9, 16, %s4563_s19, [#allocation5]  }
0x1f34   :  { %3856 = dma.done.wait [#allocation3], 32  }
0x1f35   :  { %3857 = vsyncadd [#allocation3], 4294967264 }
0x1f36   :  { %3858 = dma.done.wait [#allocation5], 16  }
0x1f37   :  { %3859 = vsyncadd [#allocation5], 4294967280 }
0x1f38   :  { %3212 = vsyncpa [#allocation3], 1 }
0x1f39   :  { %3213 = vsyncpa [#allocation5], 1 }

</bundles_post_ra>
